<compile_context>
chip_gen: v7x
topology: tpu7x:2x2x1
jax: 0.10.0
libtpu: 0.0.40
codegen_flags: <defaults>
</compile_context>

<pallas_src>
import functools

import jax
import jax.numpy as jnp
from jax.experimental import pallas as pl
from jax.experimental.pallas import tpu as pltpu

RADIUS_OF_INFLUENCE = 0.7   # radius used by build_pyg_batch_time's radius graph
OUT_PAD = 128               # lane-dense output width (out_dim is sliced in wrapper)


# ----------------------------------------------------------------------------
# In-kernel dense multi-head GATv2 over G independent graphs of N nodes
# (PyG GATv2Conv semantics: e_ij = att . leaky(xr_i + xl_j), softmax over j,
#  out_i = sum_j alpha_ij * xl_j, heads concatenated, + bias), fused ReLU.
# ----------------------------------------------------------------------------
def _gatv2_batched(x_flat, mask, w_ref, ab_ref, *, G, N, heads, C):
    """x_flat: (G*N, Fin); mask: (G, N, N) bool; w_ref: (2, Fin, H*C) ref with
    [0]=lin_l (source proj) / [1]=lin_r (target proj); ab_ref: (2, H*C) ref with
    row 0 = attention vector (head-major), row 1 = bias.  Returns (G*N, H*C)."""
    HC = heads * C
    xl = jnp.dot(x_flat, w_ref[0], preferred_element_type=jnp.float32)   # (G*N, HC)
    xr = jnp.dot(x_flat, w_ref[1], preferred_element_type=jnp.float32)   # (G*N, HC)
    ab = ab_ref[...]                                   # single load per layer
    att = ab[0:1].reshape(1, 1, 1, HC)
    bias = ab[1:2].reshape(1, 1, HC)

    xl3 = xl.reshape(G, N, HC)
    xr3 = xr.reshape(G, N, HC)

    # Full-width (all heads at once) attention logits.
    e = xr3[:, :, None, :] + xl3[:, None, :, :]        # (G, N_i, N_j, HC)
    e = jnp.maximum(e, 0.2 * e)                        # LeakyReLU(0.2), 1 VALU op
    e = e * att                                        # att multiply at full width

    outs = []
    for h in range(heads):                             # static unroll, heads small
        lo = h * C
        s = jnp.sum(e[..., lo:lo + C], axis=-1)        # (G, N, N)
        s = jnp.where(mask, s, jnp.float32(-1e30))     # single mask (exp() ~ 0 after)
        s = s - jnp.max(s, axis=-1, keepdims=True)     # stable softmax
        p = jnp.exp(s)
        alpha = p * pl.reciprocal(jnp.sum(p, axis=-1, keepdims=True), approx=False)
        outs.append(jnp.einsum('gij,gjc->gic', alpha, xl3[..., lo:lo + C],
                               preferred_element_type=jnp.float32))       # (G, N, C)
    out = jnp.concatenate(outs, axis=-1) + bias        # (G, N, HC)
    return jnp.maximum(out, 0.0).reshape(G * N, HC)    # fused F.relu


# ----------------------------------------------------------------------------
# The single fused kernel: G graphs per grid step
# ----------------------------------------------------------------------------
def _ldgn_kernel(nodes_ref, sel_ref,
                 enc_w1_ref, enc_w2_ref, enc_b_ref,
                 c1_w_ref, c1_ab_ref, c2_w_ref, c2_ab_ref,
                 head_w1_ref, head_b1_ref, head_w2_ref, head_b2_ref,
                 out_ref, *, G, n, heads, hidden):
    N = n
    x_in = nodes_ref[0]                                # (G, N, Din)
    sel = sel_ref[0]                                   # (G, G*N) one-hot gather rows

    # Radius-graph adjacency computed in-kernel from the resident node block.
    # Diagonal distance is 0 <= r^2, so self-loops are always included.
    pos = x_in[:, :, :2]
    diff = pos[:, :, None, :] - pos[:, None, :, :]
    d2 = jnp.sum(diff * diff, axis=-1)                 # (G, N, N)
    mask = d2 <= jnp.float32(RADIUS_OF_INFLUENCE ** 2)

    x_flat = x_in.reshape(G * N, x_in.shape[-1])       # flatten graphs for matmuls

    # encoder MLP (Linear + ReLU + Linear) followed by the explicit F.relu
    enc_b = enc_b_ref[...]                             # (2, hidden)
    h1 = jnp.maximum(
        jnp.dot(x_flat, enc_w1_ref[...], preferred_element_type=jnp.float32)
        + enc_b[0:1], 0.0)
    x = jnp.maximum(
        jnp.dot(h1, enc_w2_ref[...], preferred_element_type=jnp.float32)
        + enc_b[1:2], 0.0)
    x1 = jnp.dot(sel, x, preferred_element_type=jnp.float32)      # (G, hidden)

    # conv1: GATv2(hidden -> hidden, heads) + relu (fused)
    x = _gatv2_batched(x, mask, c1_w_ref, c1_ab_ref, G=G, N=N, heads=heads, C=hidden)
    x2 = jnp.dot(sel, x, preferred_element_type=jnp.float32)      # (G, heads*hidden)

    # TODO(synk): dm_mask from build_pyg_batch_time is unavailable; treated as
    # all-ones, so the elementwise multiply is an identity and is skipped.

    # conv2: GATv2(hidden*heads -> hidden, heads) + relu (fused)
    x = _gatv2_batched(x, mask, c2_w_ref, c2_ab_ref, G=G, N=N, heads=heads, C=hidden)
    x3 = jnp.dot(sel, x, preferred_element_type=jnp.float32)      # (G, heads*hidden)

    x_cat = jnp.concatenate([x1, x2, x3], axis=-1)     # (G, final_latent)

    # Dueling head: hcat = [relu(Q hidden) | relu(V hidden)]; head_w2/head_b2
    # were pre-packed so one lane-dense (G,128) matmul yields q - mean(q) + v
    # in lanes [:out_dim] (remaining lanes hold garbage and are sliced off).
    hcat = jnp.maximum(
        jnp.dot(x_cat, head_w1_ref[...], preferred_element_type=jnp.float32)
        + head_b1_ref[...], 0.0)                       # (G, 2*hidden)
    out = (jnp.dot(hcat, head_w2_ref[...], preferred_element_type=jnp.float32)
           + head_b2_ref[...])                         # (G, 128)
    out_ref[0] = out                                   # unmasked lane-dense store


# ----------------------------------------------------------------------------
# Parameters: deterministic synthetic init, packed into lane-aligned slabs
# (packing is done ONCE here, not in the per-call wrapper).
# ----------------------------------------------------------------------------
def init_params(key, input_dim, hidden_dim, heads, output_dim):
    assert output_dim <= OUT_PAD
    hh = heads * hidden_dim
    fl = hidden_dim + 2 * hh                           # final_latent_dim
    keys = iter(jax.random.split(key, 24))

    def w(shape, scale=0.1):
        return scale * jax.random.normal(next(keys), shape, jnp.float32)

    # raw (module-layout) parameters
    enc_w1, enc_b1 = w((input_dim, hidden_dim)), w((hidden_dim,))
    enc_w2, enc_b2 = w((hidden_dim, hidden_dim)), w((hidden_dim,))
    c1_wl, c1_wr = w((hidden_dim, hh)), w((hidden_dim, hh))
    c1_att, c1_b = w((heads, hidden_dim)), w((hh,))
    c2_wl, c2_wr = w((hh, hh)), w((hh, hh))
    c2_att, c2_b = w((heads, hidden_dim)), w((hh,))
    q_w1, q_b1 = w((fl, hidden_dim)), w((hidden_dim,))
    q_w2, q_b2 = w((hidden_dim, output_dim)), w((output_dim,))
    v_w1, v_b1 = w((fl, hidden_dim)), w((hidden_dim,))
    v_w2, v_b2 = w((hidden_dim, 1)), w((1,))

    p = {}
    # encoder
    p["enc_w1"] = enc_w1
    p["enc_w2"] = enc_w2
    p["enc_b"] = jnp.stack([enc_b1, enc_b2], axis=0)                  # (2, hidden)
    # conv1 / conv2 (lin_l, lin_r stacked; att+bias stacked)
    p["c1_w"] = jnp.stack([c1_wl, c1_wr], axis=0)                     # (2, hidden, hh)
    p["c1_ab"] = jnp.stack([c1_att.reshape(hh), c1_b], axis=0)        # (2, hh)
    p["c2_w"] = jnp.stack([c2_wl, c2_wr], axis=0)                     # (2, hh, hh)
    p["c2_ab"] = jnp.stack([c2_att.reshape(hh), c2_b], axis=0)        # (2, hh)
    # dueling head, hidden layer: [Q | V] concatenated along lanes
    p["head_w1"] = jnp.concatenate([q_w1, v_w1], axis=1)              # (fl, 2*hidden)
    p["head_b1"] = jnp.concatenate([q_b1, v_b1], axis=0)[None]        # (1, 2*hidden)
    # dueling head, output layer: fold q-mean subtraction and +V into one
    # (2*hidden, 128) slab -> out = q - mean(q) + v in lanes [:output_dim].
    w2q = jnp.zeros((hidden_dim, OUT_PAD), jnp.float32).at[:, :output_dim].set(q_w2)
    w2q = w2q - jnp.mean(q_w2, axis=1, keepdims=True)                 # -q_mean (linear part)
    w2v = jnp.broadcast_to(v_w2, (hidden_dim, OUT_PAD))               # +v on every lane
    p["head_w2"] = jnp.concatenate([w2q, w2v], axis=0)                # (2*hidden, 128)
    b2 = jnp.zeros((OUT_PAD,), jnp.float32).at[:output_dim].set(q_b2)
    p["head_b2"] = (b2 - jnp.mean(q_b2) + v_b2[0])[None]              # (1, 128)
    return p


# ----------------------------------------------------------------------------
# Forward pass: obs parsing glue + ONE pallas_call over cdiv(B, G) steps
# ----------------------------------------------------------------------------
def _choose_graphs_per_step(batch, n):
    g = max(1, 128 // n)                 # target ~128 node rows per grid step
    g = min(g, max(1, (batch + 1) // 2)) # keep >= 2 grid steps when possible (v7x: 2 TCs)
    return g


def ldgn_forward(obs, params, *, agents_num, input_dim, hidden_dim, num_heads,
                 output_dim, graphs_per_step=None):
    B = obs.shape[0]
    N = agents_num
    G = graphs_per_step or _choose_graphs_per_step(B, N)
    T = -(-B // G)                       # grid length
    B_pad = T * G

    # ---- parse obs -> node features + controlling-agent index ----
    nodes = obs[:, : N * input_dim].reshape(B, N, input_dim).astype(jnp.float32)
    agent_idx = obs[:, -1].astype(jnp.int32)                          # (B,)
    if B_pad != B:
        nodes = jnp.pad(nodes, ((0, B_pad - B), (0, 0), (0, 0)))
        agent_idx = jnp.pad(agent_idx, (0, B_pad - B))

    # One-hot selection of each graph's controlling agent inside its step slab of
    # G*N node rows -> the three per-layer gathers become single MXU matmuls.
    local = jnp.arange(B_pad, dtype=jnp.int32) % G
    tgt = local * N + agent_idx
    sel = (jnp.arange(G * N, dtype=jnp.int32)[None, :] == tgt[:, None]).astype(jnp.float32)

    nodes = nodes.reshape(T, G, N, input_dim)
    sel = sel.reshape(T, G, G * N)

    weights = (params["enc_w1"], params["enc_w2"], params["enc_b"],
               params["c1_w"], params["c1_ab"],
               params["c2_w"], params["c2_ab"],
               params["head_w1"], params["head_b1"],
               params["head_w2"], params["head_b2"])

    def _full(shape):                    # whole-array block, invariant across steps
        nd = len(shape)
        return pl.BlockSpec(shape, lambda t, _nd=nd: (0,) * _nd)

    kernel = functools.partial(_ldgn_kernel, G=G, n=N, heads=num_heads, hidden=hidden_dim)

    out = pl.pallas_call(
        kernel,
        out_shape=jax.ShapeDtypeStruct((T, G, OUT_PAD), jnp.float32),
        grid=(T,),
        in_specs=[
            pl.BlockSpec((1, G, N, input_dim), lambda t: (t, 0, 0, 0)),
            pl.BlockSpec((1, G, G * N), lambda t: (t, 0, 0)),
            *[_full(w.shape) for w in weights],
        ],
        out_specs=pl.BlockSpec((1, G, OUT_PAD), lambda t: (t, 0, 0)),
        compiler_params=pltpu.CompilerParams(dimension_semantics=("parallel",)),
    )(nodes, sel, *weights)

    return out.reshape(B_pad, OUT_PAD)[:B, :output_dim]               # (B, #actions)


# ----------------------------------------------------------------------------
# Main
# ----------------------------------------------------------------------------
if __name__ == "__main__":
    B, N, node_dim = 2, 8, 6
    hidden, heads, out_dim = 32, 2, 5

    key = jax.random.PRNGKey(0)
    k_nodes, k_idx, k_params = jax.random.split(key, 3)

    nodes = jax.random.uniform(k_nodes, (B, N, node_dim), jnp.float32)
    ctrl_idx = jax.random.randint(k_idx, (B, 1), 0, N).astype(jnp.float32)
    obs = jnp.concatenate([nodes.reshape(B, -1), ctrl_idx], axis=1)   # (B, N*dim + 1)

    params = init_params(k_params, node_dim, hidden, heads, out_dim)

    fwd = jax.jit(functools.partial(
        ldgn_forward, agents_num=N, input_dim=node_dim,
        hidden_dim=hidden, num_heads=heads, output_dim=out_dim))

    out = fwd(obs, params)
    jax.block_until_ready(out)
    assert out.shape == (B, out_dim), out.shape
    assert bool(jnp.all(jnp.isfinite(out)))
    print("KERNEL_OK")
</pallas_src>

<mosaic_0001>
module attributes {stable_mosaic.version = 11 : i64} {
  func.func @_ldgn_kernel(%arg0: i32, %arg1: memref<1x1x8x6xf32, #tpu.memory_space<vmem>>, %arg2: memref<1x1x8xf32, #tpu.memory_space<vmem>>, %arg3: memref<6x32xf32, #tpu.memory_space<vmem>>, %arg4: memref<32x32xf32, #tpu.memory_space<vmem>>, %arg5: memref<2x32xf32, #tpu.memory_space<vmem>>, %arg6: memref<2x32x64xf32, #tpu.memory_space<vmem>>, %arg7: memref<2x64xf32, #tpu.memory_space<vmem>>, %arg8: memref<2x64x64xf32, #tpu.memory_space<vmem>>, %arg9: memref<2x64xf32, #tpu.memory_space<vmem>>, %arg10: memref<160x64xf32, #tpu.memory_space<vmem>>, %arg11: memref<1x64xf32, #tpu.memory_space<vmem>>, %arg12: memref<64x128xf32, #tpu.memory_space<vmem>>, %arg13: memref<1x128xf32, #tpu.memory_space<vmem>>, %arg14: memref<1x1x128xf32, #tpu.memory_space<vmem>>) attributes {dimension_semantics = [#tpu.dimension_semantics<parallel>], iteration_bounds = array<i64: 2>, scalar_prefetch = 0 : i64, scratch_operands = 0 : i64, tpu.core_type = #tpu.core_type<tc>, window_params = [{transform_indices = @transform_0, window_bounds = array<i64: 1, 1, 8, 6>}, {transform_indices = @transform_1, window_bounds = array<i64: 1, 1, 8>}, {pipeline_mode = #tpu.pipeline_mode<synchronous>, transform_indices = @transform_2, window_bounds = array<i64: 6, 32>}, {pipeline_mode = #tpu.pipeline_mode<synchronous>, transform_indices = @transform_3, window_bounds = array<i64: 32, 32>}, {pipeline_mode = #tpu.pipeline_mode<synchronous>, transform_indices = @transform_4, window_bounds = array<i64: 2, 32>}, {pipeline_mode = #tpu.pipeline_mode<synchronous>, transform_indices = @transform_5, window_bounds = array<i64: 2, 32, 64>}, {pipeline_mode = #tpu.pipeline_mode<synchronous>, transform_indices = @transform_6, window_bounds = array<i64: 2, 64>}, {pipeline_mode = #tpu.pipeline_mode<synchronous>, transform_indices = @transform_7, window_bounds = array<i64: 2, 64, 64>}, {pipeline_mode = #tpu.pipeline_mode<synchronous>, transform_indices = @transform_8, window_bounds = array<i64: 2, 64>}, {pipeline_mode = #tpu.pipeline_mode<synchronous>, transform_indices = @transform_9, window_bounds = array<i64: 160, 64>}, {pipeline_mode = #tpu.pipeline_mode<synchronous>, transform_indices = @transform_10, window_bounds = array<i64: 1, 64>}, {pipeline_mode = #tpu.pipeline_mode<synchronous>, transform_indices = @transform_11, window_bounds = array<i64: 64, 128>}, {pipeline_mode = #tpu.pipeline_mode<synchronous>, transform_indices = @transform_12, window_bounds = array<i64: 1, 128>}, {transform_indices = @transform_13, window_bounds = array<i64: 1, 1, 128>}]} {
    %c0 = arith.constant 0 : index
    %c0_0 = arith.constant 0 : index
    %c0_1 = arith.constant 0 : index
    %c0_2 = arith.constant 0 : index
    %0 = vector.load %arg1[%c0, %c0_0, %c0_1, %c0_2] : memref<1x1x8x6xf32, #tpu.memory_space<vmem>>, vector<1x1x8x6xf32>
    %1 = vector.shape_cast %0 : vector<1x1x8x6xf32> to vector<1x8x6xf32>
    %c0_3 = arith.constant 0 : index
    %c0_4 = arith.constant 0 : index
    %c0_5 = arith.constant 0 : index
    %2 = vector.load %arg2[%c0_3, %c0_4, %c0_5] : memref<1x1x8xf32, #tpu.memory_space<vmem>>, vector<1x1x8xf32>
    %3 = vector.shape_cast %2 : vector<1x1x8xf32> to vector<1x8xf32>
    %4 = vector.extract_strided_slice %1 {offsets = [0, 0, 0], sizes = [1, 8, 2], strides = [1, 1, 1]} : vector<1x8x6xf32> to vector<1x8x2xf32>
    %5 = vector.shape_cast %4 : vector<1x8x2xf32> to vector<1x8x1x2xf32>
    %6 = vector.shape_cast %4 : vector<1x8x2xf32> to vector<1x1x8x2xf32>
    %7 = vector.broadcast %5 : vector<1x8x1x2xf32> to vector<1x8x8x2xf32>
    %8 = vector.broadcast %6 : vector<1x1x8x2xf32> to vector<1x8x8x2xf32>
    %9 = arith.subf %7, %8 : vector<1x8x8x2xf32>
    %10 = arith.mulf %9, %9 : vector<1x8x8x2xf32>
    %cst = arith.constant dense<0.000000e+00> : vector<1x8x8xf32>
    %11 = vector.multi_reduction <add>, %10, %cst [3] : vector<1x8x8x2xf32> to vector<1x8x8xf32>
    %cst_6 = arith.constant 4.900000e-01 : f32
    %12 = vector.broadcast %cst_6 : f32 to vector<1x8x8xf32>
    %13 = arith.cmpf ole, %11, %12 : vector<1x8x8xf32>
    %14 = vector.shape_cast %1 : vector<1x8x6xf32> to vector<8x6xf32>
    %c0_7 = arith.constant 0 : index
    %c0_8 = arith.constant 0 : index
    %15 = vector.load %arg5[%c0_7, %c0_8] : memref<2x32xf32, #tpu.memory_space<vmem>>, vector<2x32xf32>
    %c0_9 = arith.constant 0 : index
    %c0_10 = arith.constant 0 : index
    %16 = vector.load %arg3[%c0_9, %c0_10] : memref<6x32xf32, #tpu.memory_space<vmem>>, vector<6x32xf32>
    %cst_11 = arith.constant dense<0.000000e+00> : vector<8x32xf32>
    %17 = tpu.matmul %14, %16, %cst_11 {dimension_numbers = #tpu.dot_dimension_numbers<[1], [0], [0], [1], [0, 0, 1, 1], [], []>} : vector<8x6xf32>, vector<6x32xf32>, vector<8x32xf32> -> vector<8x32xf32>
    %18 = vector.extract_strided_slice %15 {offsets = [0, 0], sizes = [1, 32], strides = [1, 1]} : vector<2x32xf32> to vector<1x32xf32>
    %19 = vector.broadcast %18 : vector<1x32xf32> to vector<8x32xf32>
    %20 = arith.addf %17, %19 : vector<8x32xf32>
    %cst_12 = arith.constant 0.000000e+00 : f32
    %21 = vector.broadcast %cst_12 : f32 to vector<8x32xf32>
    %22 = arith.maximumf %20, %21 : vector<8x32xf32>
    %c0_13 = arith.constant 0 : index
    %c0_14 = arith.constant 0 : index
    %23 = vector.load %arg4[%c0_13, %c0_14] : memref<32x32xf32, #tpu.memory_space<vmem>>, vector<32x32xf32>
    %cst_15 = arith.constant dense<0.000000e+00> : vector<8x32xf32>
    %24 = tpu.matmul %22, %23, %cst_15 {dimension_numbers = #tpu.dot_dimension_numbers<[1], [0], [0], [1], [0, 0, 1, 1], [], []>} : vector<8x32xf32>, vector<32x32xf32>, vector<8x32xf32> -> vector<8x32xf32>
    %25 = vector.extract_strided_slice %15 {offsets = [1, 0], sizes = [1, 32], strides = [1, 1]} : vector<2x32xf32> to vector<1x32xf32>
    %26 = vector.broadcast %25 : vector<1x32xf32> to vector<8x32xf32>
    %27 = arith.addf %24, %26 : vector<8x32xf32>
    %cst_16 = arith.constant 0.000000e+00 : f32
    %28 = vector.broadcast %cst_16 : f32 to vector<8x32xf32>
    %29 = arith.maximumf %27, %28 : vector<8x32xf32>
    %cst_17 = arith.constant dense<0.000000e+00> : vector<1x32xf32>
    %30 = tpu.matmul %3, %29, %cst_17 {dimension_numbers = #tpu.dot_dimension_numbers<[1], [0], [0], [1], [0, 0, 1, 1], [], []>} : vector<1x8xf32>, vector<8x32xf32>, vector<1x32xf32> -> vector<1x32xf32>
    %c0_18 = arith.constant 0 : index
    %c0_19 = arith.constant 0 : index
    %c0_20 = arith.constant 0 : index
    %31 = vector.load %arg6[%c0_18, %c0_19, %c0_20] : memref<2x32x64xf32, #tpu.memory_space<vmem>>, vector<1x32x64xf32>
    %32 = vector.shape_cast %31 : vector<1x32x64xf32> to vector<32x64xf32>
    %cst_21 = arith.constant dense<0.000000e+00> : vector<8x64xf32>
    %33 = tpu.matmul %29, %32, %cst_21 {dimension_numbers = #tpu.dot_dimension_numbers<[1], [0], [0], [1], [0, 0, 1, 1], [], []>} : vector<8x32xf32>, vector<32x64xf32>, vector<8x64xf32> -> vector<8x64xf32>
    %c1 = arith.constant 1 : index
    %c0_22 = arith.constant 0 : index
    %c0_23 = arith.constant 0 : index
    %34 = vector.load %arg6[%c1, %c0_22, %c0_23] : memref<2x32x64xf32, #tpu.memory_space<vmem>>, vector<1x32x64xf32>
    %35 = vector.shape_cast %34 : vector<1x32x64xf32> to vector<32x64xf32>
    %cst_24 = arith.constant dense<0.000000e+00> : vector<8x64xf32>
    %36 = tpu.matmul %29, %35, %cst_24 {dimension_numbers = #tpu.dot_dimension_numbers<[1], [0], [0], [1], [0, 0, 1, 1], [], []>} : vector<8x32xf32>, vector<32x64xf32>, vector<8x64xf32> -> vector<8x64xf32>
    %c0_25 = arith.constant 0 : index
    %c0_26 = arith.constant 0 : index
    %37 = vector.load %arg7[%c0_25, %c0_26] : memref<2x64xf32, #tpu.memory_space<vmem>>, vector<2x64xf32>
    %38 = vector.extract_strided_slice %37 {offsets = [0, 0], sizes = [1, 64], strides = [1, 1]} : vector<2x64xf32> to vector<1x64xf32>
    %39 = vector.shape_cast %38 : vector<1x64xf32> to vector<1x1x1x64xf32>
    %40 = vector.extract_strided_slice %37 {offsets = [1, 0], sizes = [1, 64], strides = [1, 1]} : vector<2x64xf32> to vector<1x64xf32>
    %41 = vector.shape_cast %40 : vector<1x64xf32> to vector<1x1x64xf32>
    %42 = vector.shape_cast %33 : vector<8x64xf32> to vector<1x8x64xf32>
    %43 = vector.shape_cast %36 : vector<8x64xf32> to vector<1x8x64xf32>
    %44 = vector.shape_cast %43 : vector<1x8x64xf32> to vector<1x8x1x64xf32>
    %45 = vector.shape_cast %42 : vector<1x8x64xf32> to vector<1x1x8x64xf32>
    %46 = vector.broadcast %44 : vector<1x8x1x64xf32> to vector<1x8x8x64xf32>
    %47 = vector.broadcast %45 : vector<1x1x8x64xf32> to vector<1x8x8x64xf32>
    %48 = arith.addf %46, %47 : vector<1x8x8x64xf32>
    %cst_27 = arith.constant 2.000000e-01 : f32
    %49 = vector.broadcast %cst_27 : f32 to vector<1x8x8x64xf32>
    %50 = arith.mulf %49, %48 : vector<1x8x8x64xf32>
    %51 = arith.maximumf %48, %50 : vector<1x8x8x64xf32>
    %52 = vector.broadcast %39 : vector<1x1x1x64xf32> to vector<1x8x8x64xf32>
    %53 = arith.mulf %51, %52 : vector<1x8x8x64xf32>
    %54 = vector.extract_strided_slice %53 {offsets = [0, 0, 0, 0], sizes = [1, 8, 8, 32], strides = [1, 1, 1, 1]} : vector<1x8x8x64xf32> to vector<1x8x8x32xf32>
    %cst_28 = arith.constant dense<0.000000e+00> : vector<1x8x8xf32>
    %55 = vector.multi_reduction <add>, %54, %cst_28 [3] : vector<1x8x8x32xf32> to vector<1x8x8xf32>
    %cst_29 = arith.constant -1.000000e+30 : f32
    %56 = vector.broadcast %cst_29 : f32 to vector<1x8x8xf32>
    %57 = arith.select %13, %55, %56 : vector<1x8x8xi1>, vector<1x8x8xf32>
    %cst_30 = arith.constant dense<0xFF800000> : vector<1x8xf32>
    %58 = vector.multi_reduction <maximumf>, %57, %cst_30 [2] : vector<1x8x8xf32> to vector<1x8xf32>
    %59 = vector.shape_cast %58 : vector<1x8xf32> to vector<1x8x1xf32>
    %60 = vector.broadcast %59 : vector<1x8x1xf32> to vector<1x8x8xf32>
    %61 = arith.subf %57, %60 : vector<1x8x8xf32>
    %62 = math.exp %61 : vector<1x8x8xf32>
    %cst_31 = arith.constant dense<0.000000e+00> : vector<1x8xf32>
    %63 = vector.multi_reduction <add>, %62, %cst_31 [2] : vector<1x8x8xf32> to vector<1x8xf32>
    %64 = vector.shape_cast %63 : vector<1x8xf32> to vector<1x8x1xf32>
    %65 = tpu.reciprocal %64 : vector<1x8x1xf32> -> vector<1x8x1xf32>
    %66 = vector.broadcast %65 : vector<1x8x1xf32> to vector<1x8x8xf32>
    %67 = arith.mulf %62, %66 : vector<1x8x8xf32>
    %68 = vector.extract_strided_slice %42 {offsets = [0, 0, 0], sizes = [1, 8, 32], strides = [1, 1, 1]} : vector<1x8x64xf32> to vector<1x8x32xf32>
    "tpu.trace_start"() <{level = 10 : i32, message = "gij,gjc->gic"}> : () -> ()
    %cst_32 = arith.constant dense<0.000000e+00> : vector<1x8x32xf32>
    %69 = tpu.matmul %67, %68, %cst_32 {dimension_numbers = #tpu.dot_dimension_numbers<[2], [1], [1], [2], [0, 0, 0, 1, 1, 2], [0], [0]>} : vector<1x8x8xf32>, vector<1x8x32xf32>, vector<1x8x32xf32> -> vector<1x8x32xf32>
    "tpu.trace_stop"() : () -> ()
    %70 = vector.extract_strided_slice %53 {offsets = [0, 0, 0, 32], sizes = [1, 8, 8, 32], strides = [1, 1, 1, 1]} : vector<1x8x8x64xf32> to vector<1x8x8x32xf32>
    %cst_33 = arith.constant dense<0.000000e+00> : vector<1x8x8xf32>
    %71 = vector.multi_reduction <add>, %70, %cst_33 [3] : vector<1x8x8x32xf32> to vector<1x8x8xf32>
    %cst_34 = arith.constant -1.000000e+30 : f32
    %72 = vector.broadcast %cst_34 : f32 to vector<1x8x8xf32>
    %73 = arith.select %13, %71, %72 : vector<1x8x8xi1>, vector<1x8x8xf32>
    %cst_35 = arith.constant dense<0xFF800000> : vector<1x8xf32>
    %74 = vector.multi_reduction <maximumf>, %73, %cst_35 [2] : vector<1x8x8xf32> to vector<1x8xf32>
    %75 = vector.shape_cast %74 : vector<1x8xf32> to vector<1x8x1xf32>
    %76 = vector.broadcast %75 : vector<1x8x1xf32> to vector<1x8x8xf32>
    %77 = arith.subf %73, %76 : vector<1x8x8xf32>
    %78 = math.exp %77 : vector<1x8x8xf32>
    %cst_36 = arith.constant dense<0.000000e+00> : vector<1x8xf32>
    %79 = vector.multi_reduction <add>, %78, %cst_36 [2] : vector<1x8x8xf32> to vector<1x8xf32>
    %80 = vector.shape_cast %79 : vector<1x8xf32> to vector<1x8x1xf32>
    %81 = tpu.reciprocal %80 : vector<1x8x1xf32> -> vector<1x8x1xf32>
    %82 = vector.broadcast %81 : vector<1x8x1xf32> to vector<1x8x8xf32>
    %83 = arith.mulf %78, %82 : vector<1x8x8xf32>
    %84 = vector.extract_strided_slice %42 {offsets = [0, 0, 32], sizes = [1, 8, 32], strides = [1, 1, 1]} : vector<1x8x64xf32> to vector<1x8x32xf32>
    "tpu.trace_start"() <{level = 10 : i32, message = "gij,gjc->gic"}> : () -> ()
    %cst_37 = arith.constant dense<0.000000e+00> : vector<1x8x32xf32>
    %85 = tpu.matmul %83, %84, %cst_37 {dimension_numbers = #tpu.dot_dimension_numbers<[2], [1], [1], [2], [0, 0, 0, 1, 1, 2], [0], [0]>} : vector<1x8x8xf32>, vector<1x8x32xf32>, vector<1x8x32xf32> -> vector<1x8x32xf32>
    "tpu.trace_stop"() : () -> ()
    %86 = tpu.concatenate %69, %85 in 2 : vector<1x8x32xf32>, vector<1x8x32xf32> -> vector<1x8x64xf32>
    %87 = vector.broadcast %41 : vector<1x1x64xf32> to vector<1x8x64xf32>
    %88 = arith.addf %86, %87 : vector<1x8x64xf32>
    %cst_38 = arith.constant 0.000000e+00 : f32
    %89 = vector.broadcast %cst_38 : f32 to vector<1x8x64xf32>
    %90 = arith.maximumf %88, %89 : vector<1x8x64xf32>
    %91 = vector.shape_cast %90 : vector<1x8x64xf32> to vector<8x64xf32>
    %cst_39 = arith.constant dense<0.000000e+00> : vector<1x64xf32>
    %92 = tpu.matmul %3, %91, %cst_39 {dimension_numbers = #tpu.dot_dimension_numbers<[1], [0], [0], [1], [0, 0, 1, 1], [], []>} : vector<1x8xf32>, vector<8x64xf32>, vector<1x64xf32> -> vector<1x64xf32>
    %c0_40 = arith.constant 0 : index
    %c0_41 = arith.constant 0 : index
    %c0_42 = arith.constant 0 : index
    %93 = vector.load %arg8[%c0_40, %c0_41, %c0_42] : memref<2x64x64xf32, #tpu.memory_space<vmem>>, vector<1x64x64xf32>
    %94 = vector.shape_cast %93 : vector<1x64x64xf32> to vector<64x64xf32>
    %cst_43 = arith.constant dense<0.000000e+00> : vector<8x64xf32>
    %95 = tpu.matmul %91, %94, %cst_43 {dimension_numbers = #tpu.dot_dimension_numbers<[1], [0], [0], [1], [0, 0, 1, 1], [], []>} : vector<8x64xf32>, vector<64x64xf32>, vector<8x64xf32> -> vector<8x64xf32>
    %c1_44 = arith.constant 1 : index
    %c0_45 = arith.constant 0 : index
    %c0_46 = arith.constant 0 : index
    %96 = vector.load %arg8[%c1_44, %c0_45, %c0_46] : memref<2x64x64xf32, #tpu.memory_space<vmem>>, vector<1x64x64xf32>
    %97 = vector.shape_cast %96 : vector<1x64x64xf32> to vector<64x64xf32>
    %cst_47 = arith.constant dense<0.000000e+00> : vector<8x64xf32>
    %98 = tpu.matmul %91, %97, %cst_47 {dimension_numbers = #tpu.dot_dimension_numbers<[1], [0], [0], [1], [0, 0, 1, 1], [], []>} : vector<8x64xf32>, vector<64x64xf32>, vector<8x64xf32> -> vector<8x64xf32>
    %c0_48 = arith.constant 0 : index
    %c0_49 = arith.constant 0 : index
    %99 = vector.load %arg9[%c0_48, %c0_49] : memref<2x64xf32, #tpu.memory_space<vmem>>, vector<2x64xf32>
    %100 = vector.extract_strided_slice %99 {offsets = [0, 0], sizes = [1, 64], strides = [1, 1]} : vector<2x64xf32> to vector<1x64xf32>
    %101 = vector.shape_cast %100 : vector<1x64xf32> to vector<1x1x1x64xf32>
    %102 = vector.extract_strided_slice %99 {offsets = [1, 0], sizes = [1, 64], strides = [1, 1]} : vector<2x64xf32> to vector<1x64xf32>
    %103 = vector.shape_cast %102 : vector<1x64xf32> to vector<1x1x64xf32>
    %104 = vector.shape_cast %95 : vector<8x64xf32> to vector<1x8x64xf32>
    %105 = vector.shape_cast %98 : vector<8x64xf32> to vector<1x8x64xf32>
    %106 = vector.shape_cast %105 : vector<1x8x64xf32> to vector<1x8x1x64xf32>
    %107 = vector.shape_cast %104 : vector<1x8x64xf32> to vector<1x1x8x64xf32>
    %108 = vector.broadcast %106 : vector<1x8x1x64xf32> to vector<1x8x8x64xf32>
    %109 = vector.broadcast %107 : vector<1x1x8x64xf32> to vector<1x8x8x64xf32>
    %110 = arith.addf %108, %109 : vector<1x8x8x64xf32>
    %cst_50 = arith.constant 2.000000e-01 : f32
    %111 = vector.broadcast %cst_50 : f32 to vector<1x8x8x64xf32>
    %112 = arith.mulf %111, %110 : vector<1x8x8x64xf32>
    %113 = arith.maximumf %110, %112 : vector<1x8x8x64xf32>
    %114 = vector.broadcast %101 : vector<1x1x1x64xf32> to vector<1x8x8x64xf32>
    %115 = arith.mulf %113, %114 : vector<1x8x8x64xf32>
    %116 = vector.extract_strided_slice %115 {offsets = [0, 0, 0, 0], sizes = [1, 8, 8, 32], strides = [1, 1, 1, 1]} : vector<1x8x8x64xf32> to vector<1x8x8x32xf32>
    %cst_51 = arith.constant dense<0.000000e+00> : vector<1x8x8xf32>
    %117 = vector.multi_reduction <add>, %116, %cst_51 [3] : vector<1x8x8x32xf32> to vector<1x8x8xf32>
    %cst_52 = arith.constant -1.000000e+30 : f32
    %118 = vector.broadcast %cst_52 : f32 to vector<1x8x8xf32>
    %119 = arith.select %13, %117, %118 : vector<1x8x8xi1>, vector<1x8x8xf32>
    %cst_53 = arith.constant dense<0xFF800000> : vector<1x8xf32>
    %120 = vector.multi_reduction <maximumf>, %119, %cst_53 [2] : vector<1x8x8xf32> to vector<1x8xf32>
    %121 = vector.shape_cast %120 : vector<1x8xf32> to vector<1x8x1xf32>
    %122 = vector.broadcast %121 : vector<1x8x1xf32> to vector<1x8x8xf32>
    %123 = arith.subf %119, %122 : vector<1x8x8xf32>
    %124 = math.exp %123 : vector<1x8x8xf32>
    %cst_54 = arith.constant dense<0.000000e+00> : vector<1x8xf32>
    %125 = vector.multi_reduction <add>, %124, %cst_54 [2] : vector<1x8x8xf32> to vector<1x8xf32>
    %126 = vector.shape_cast %125 : vector<1x8xf32> to vector<1x8x1xf32>
    %127 = tpu.reciprocal %126 : vector<1x8x1xf32> -> vector<1x8x1xf32>
    %128 = vector.broadcast %127 : vector<1x8x1xf32> to vector<1x8x8xf32>
    %129 = arith.mulf %124, %128 : vector<1x8x8xf32>
    %130 = vector.extract_strided_slice %104 {offsets = [0, 0, 0], sizes = [1, 8, 32], strides = [1, 1, 1]} : vector<1x8x64xf32> to vector<1x8x32xf32>
    "tpu.trace_start"() <{level = 10 : i32, message = "gij,gjc->gic"}> : () -> ()
    %cst_55 = arith.constant dense<0.000000e+00> : vector<1x8x32xf32>
    %131 = tpu.matmul %129, %130, %cst_55 {dimension_numbers = #tpu.dot_dimension_numbers<[2], [1], [1], [2], [0, 0, 0, 1, 1, 2], [0], [0]>} : vector<1x8x8xf32>, vector<1x8x32xf32>, vector<1x8x32xf32> -> vector<1x8x32xf32>
    "tpu.trace_stop"() : () -> ()
    %132 = vector.extract_strided_slice %115 {offsets = [0, 0, 0, 32], sizes = [1, 8, 8, 32], strides = [1, 1, 1, 1]} : vector<1x8x8x64xf32> to vector<1x8x8x32xf32>
    %cst_56 = arith.constant dense<0.000000e+00> : vector<1x8x8xf32>
    %133 = vector.multi_reduction <add>, %132, %cst_56 [3] : vector<1x8x8x32xf32> to vector<1x8x8xf32>
    %cst_57 = arith.constant -1.000000e+30 : f32
    %134 = vector.broadcast %cst_57 : f32 to vector<1x8x8xf32>
    %135 = arith.select %13, %133, %134 : vector<1x8x8xi1>, vector<1x8x8xf32>
    %cst_58 = arith.constant dense<0xFF800000> : vector<1x8xf32>
    %136 = vector.multi_reduction <maximumf>, %135, %cst_58 [2] : vector<1x8x8xf32> to vector<1x8xf32>
    %137 = vector.shape_cast %136 : vector<1x8xf32> to vector<1x8x1xf32>
    %138 = vector.broadcast %137 : vector<1x8x1xf32> to vector<1x8x8xf32>
    %139 = arith.subf %135, %138 : vector<1x8x8xf32>
    %140 = math.exp %139 : vector<1x8x8xf32>
    %cst_59 = arith.constant dense<0.000000e+00> : vector<1x8xf32>
    %141 = vector.multi_reduction <add>, %140, %cst_59 [2] : vector<1x8x8xf32> to vector<1x8xf32>
    %142 = vector.shape_cast %141 : vector<1x8xf32> to vector<1x8x1xf32>
    %143 = tpu.reciprocal %142 : vector<1x8x1xf32> -> vector<1x8x1xf32>
    %144 = vector.broadcast %143 : vector<1x8x1xf32> to vector<1x8x8xf32>
    %145 = arith.mulf %140, %144 : vector<1x8x8xf32>
    %146 = vector.extract_strided_slice %104 {offsets = [0, 0, 32], sizes = [1, 8, 32], strides = [1, 1, 1]} : vector<1x8x64xf32> to vector<1x8x32xf32>
    "tpu.trace_start"() <{level = 10 : i32, message = "gij,gjc->gic"}> : () -> ()
    %cst_60 = arith.constant dense<0.000000e+00> : vector<1x8x32xf32>
    %147 = tpu.matmul %145, %146, %cst_60 {dimension_numbers = #tpu.dot_dimension_numbers<[2], [1], [1], [2], [0, 0, 0, 1, 1, 2], [0], [0]>} : vector<1x8x8xf32>, vector<1x8x32xf32>, vector<1x8x32xf32> -> vector<1x8x32xf32>
    "tpu.trace_stop"() : () -> ()
    %148 = tpu.concatenate %131, %147 in 2 : vector<1x8x32xf32>, vector<1x8x32xf32> -> vector<1x8x64xf32>
    %149 = vector.broadcast %103 : vector<1x1x64xf32> to vector<1x8x64xf32>
    %150 = arith.addf %148, %149 : vector<1x8x64xf32>
    %cst_61 = arith.constant 0.000000e+00 : f32
    %151 = vector.broadcast %cst_61 : f32 to vector<1x8x64xf32>
    %152 = arith.maximumf %150, %151 : vector<1x8x64xf32>
    %153 = vector.shape_cast %152 : vector<1x8x64xf32> to vector<8x64xf32>
    %cst_62 = arith.constant dense<0.000000e+00> : vector<1x64xf32>
    %154 = tpu.matmul %3, %153, %cst_62 {dimension_numbers = #tpu.dot_dimension_numbers<[1], [0], [0], [1], [0, 0, 1, 1], [], []>} : vector<1x8xf32>, vector<8x64xf32>, vector<1x64xf32> -> vector<1x64xf32>
    %155 = tpu.concatenate %30, %92, %154 in 1 : vector<1x32xf32>, vector<1x64xf32>, vector<1x64xf32> -> vector<1x160xf32>
    %c0_63 = arith.constant 0 : index
    %c0_64 = arith.constant 0 : index
    %156 = vector.load %arg10[%c0_63, %c0_64] : memref<160x64xf32, #tpu.memory_space<vmem>>, vector<160x64xf32>
    %cst_65 = arith.constant dense<0.000000e+00> : vector<1x64xf32>
    %157 = tpu.matmul %155, %156, %cst_65 {dimension_numbers = #tpu.dot_dimension_numbers<[1], [0], [0], [1], [0, 0, 1, 1], [], []>} : vector<1x160xf32>, vector<160x64xf32>, vector<1x64xf32> -> vector<1x64xf32>
    %c0_66 = arith.constant 0 : index
    %c0_67 = arith.constant 0 : index
    %158 = vector.load %arg11[%c0_66, %c0_67] : memref<1x64xf32, #tpu.memory_space<vmem>>, vector<1x64xf32>
    %159 = arith.addf %157, %158 : vector<1x64xf32>
    %cst_68 = arith.constant 0.000000e+00 : f32
    %160 = vector.broadcast %cst_68 : f32 to vector<1x64xf32>
    %161 = arith.maximumf %159, %160 : vector<1x64xf32>
    %c0_69 = arith.constant 0 : index
    %c0_70 = arith.constant 0 : index
    %162 = vector.load %arg12[%c0_69, %c0_70] : memref<64x128xf32, #tpu.memory_space<vmem>>, vector<64x128xf32>
    %cst_71 = arith.constant dense<0.000000e+00> : vector<1x128xf32>
    %163 = tpu.matmul %161, %162, %cst_71 {dimension_numbers = #tpu.dot_dimension_numbers<[1], [0], [0], [1], [0, 0, 1, 1], [], []>} : vector<1x64xf32>, vector<64x128xf32>, vector<1x128xf32> -> vector<1x128xf32>
    %c0_72 = arith.constant 0 : index
    %c0_73 = arith.constant 0 : index
    %164 = vector.load %arg13[%c0_72, %c0_73] : memref<1x128xf32, #tpu.memory_space<vmem>>, vector<1x128xf32>
    %165 = arith.addf %163, %164 : vector<1x128xf32>
    %c0_74 = arith.constant 0 : index
    %c0_75 = arith.constant 0 : index
    %c0_76 = arith.constant 0 : index
    %166 = vector.load %arg14[%c0_74, %c0_75, %c0_76] : memref<1x1x128xf32, #tpu.memory_space<vmem>>, vector<1x1x128xf32>
    %167 = vector.shape_cast %166 : vector<1x1x128xf32> to vector<1x128xf32>
    %168 = vector.shape_cast %165 : vector<1x128xf32> to vector<1x1x128xf32>
    tpu.vector_store %arg14[%c0_74, %c0_75, %c0_76], %168 {strides = array<i32>} : memref<1x1x128xf32, #tpu.memory_space<vmem>>, vector<1x1x128xf32>,
    return
  }
  func.func @transform_0(%arg0: i32) -> (i32, i32, i32, i32) {
    %c0_i32 = arith.constant 0 : i32
    %c0_i32_0 = arith.constant 0 : i32
    %c0_i32_1 = arith.constant 0 : i32
    %c0_i32_2 = arith.constant 0 : i32
    return %arg0, %c0_i32, %c0_i32_0, %c0_i32_1 : i32, i32, i32, i32
  }
  func.func @transform_1(%arg0: i32) -> (i32, i32, i32) {
    %c0_i32 = arith.constant 0 : i32
    %c0_i32_0 = arith.constant 0 : i32
    %c0_i32_1 = arith.constant 0 : i32
    return %arg0, %c0_i32, %c0_i32_0 : i32, i32, i32
  }
  func.func @transform_2(%arg0: i32) -> (i32, i32) {
    %c0_i32 = arith.constant 0 : i32
    %c0_i32_0 = arith.constant 0 : i32
    %c0_i32_1 = arith.constant 0 : i32
    return %c0_i32, %c0_i32_0 : i32, i32
  }
  func.func @transform_3(%arg0: i32) -> (i32, i32) {
    %c0_i32 = arith.constant 0 : i32
    %c0_i32_0 = arith.constant 0 : i32
    %c0_i32_1 = arith.constant 0 : i32
    return %c0_i32, %c0_i32_0 : i32, i32
  }
  func.func @transform_4(%arg0: i32) -> (i32, i32) {
    %c0_i32 = arith.constant 0 : i32
    %c0_i32_0 = arith.constant 0 : i32
    %c0_i32_1 = arith.constant 0 : i32
    return %c0_i32, %c0_i32_0 : i32, i32
  }
  func.func @transform_5(%arg0: i32) -> (i32, i32, i32) {
    %c0_i32 = arith.constant 0 : i32
    %c0_i32_0 = arith.constant 0 : i32
    %c0_i32_1 = arith.constant 0 : i32
    %c0_i32_2 = arith.constant 0 : i32
    return %c0_i32, %c0_i32_0, %c0_i32_1 : i32, i32, i32
  }
  func.func @transform_6(%arg0: i32) -> (i32, i32) {
    %c0_i32 = arith.constant 0 : i32
    %c0_i32_0 = arith.constant 0 : i32
    %c0_i32_1 = arith.constant 0 : i32
    return %c0_i32, %c0_i32_0 : i32, i32
  }
  func.func @transform_7(%arg0: i32) -> (i32, i32, i32) {
    %c0_i32 = arith.constant 0 : i32
    %c0_i32_0 = arith.constant 0 : i32
    %c0_i32_1 = arith.constant 0 : i32
    %c0_i32_2 = arith.constant 0 : i32
    return %c0_i32, %c0_i32_0, %c0_i32_1 : i32, i32, i32
  }
  func.func @transform_8(%arg0: i32) -> (i32, i32) {
    %c0_i32 = arith.constant 0 : i32
    %c0_i32_0 = arith.constant 0 : i32
    %c0_i32_1 = arith.constant 0 : i32
    return %c0_i32, %c0_i32_0 : i32, i32
  }
  func.func @transform_9(%arg0: i32) -> (i32, i32) {
    %c0_i32 = arith.constant 0 : i32
    %c0_i32_0 = arith.constant 0 : i32
    %c0_i32_1 = arith.constant 0 : i32
    return %c0_i32, %c0_i32_0 : i32, i32
  }
  func.func @transform_10(%arg0: i32) -> (i32, i32) {
    %c0_i32 = arith.constant 0 : i32
    %c0_i32_0 = arith.constant 0 : i32
    %c0_i32_1 = arith.constant 0 : i32
    return %c0_i32, %c0_i32_0 : i32, i32
  }
  func.func @transform_11(%arg0: i32) -> (i32, i32) {
    %c0_i32 = arith.constant 0 : i32
    %c0_i32_0 = arith.constant 0 : i32
    %c0_i32_1 = arith.constant 0 : i32
    return %c0_i32, %c0_i32_0 : i32, i32
  }
  func.func @transform_12(%arg0: i32) -> (i32, i32) {
    %c0_i32 = arith.constant 0 : i32
    %c0_i32_0 = arith.constant 0 : i32
    %c0_i32_1 = arith.constant 0 : i32
    return %c0_i32, %c0_i32_0 : i32, i32
  }
  func.func @transform_13(%arg0: i32) -> (i32, i32, i32) {
    %c0_i32 = arith.constant 0 : i32
    %c0_i32_0 = arith.constant 0 : i32
    %c0_i32_1 = arith.constant 0 : i32
    return %arg0, %c0_i32, %c0_i32_0 : i32, i32, i32
  }
}

</mosaic_0001>

<bundles_post_ra>
// kernel: ldgn_forward.1
= control target key start
LH: loop header
LB: loop body
LE: loop exit
PB: predicated region body
PF: predicated region fallthrough
CT: control target
= control target key end

     0   :  { %s5336_s0 = inlined_call_operand.vmem [shape: f32[2,1,8,6], index: 0, kind: input, shape index: {}]   ;;  %s5337_s1 = inlined_call_operand.vmem [shape: f32[2,1,8], index: 1, kind: input, shape index: {}]   ;;  %s5338_s2 = inlined_call_operand.vmem [shape: f32[6,32], index: 2, kind: input, shape index: {}]   ;;  %s5339_s3 = inlined_call_operand.vmem [shape: f32[32,32], index: 3, kind: input, shape index: {}]   ;;  %s5340_s4 = inlined_call_operand.vmem [shape: f32[2,32], index: 4, kind: input, shape index: {}]   ;;  %s5341_s5 = inlined_call_operand.vmem [shape: f32[2,32,64], index: 5, kind: input, shape index: {}]   ;;  %s5342_s6 = inlined_call_operand.vmem [shape: f32[2,64], index: 6, kind: input, shape index: {}]   ;;  %s5343_s7 = inlined_call_operand.vmem [shape: f32[2,64,64], index: 7, kind: input, shape index: {}]   ;;  %s5344_s8 = inlined_call_operand.vmem [shape: f32[2,64], index: 8, kind: input, shape index: {}]   ;;  %s5345_s9 = inlined_call_operand.vmem [shape: f32[160,64], index: 9, kind: input, shape index: {}]   ;;  %s5346_s10 = inlined_call_operand.vmem [shape: f32[1,64], index: 10, kind: input, shape index: {}]   ;;  %s5347_s11 = inlined_call_operand.vmem [shape: f32[64,128], index: 11, kind: input, shape index: {}]   ;;  %s5348_s12 = inlined_call_operand.vmem [shape: f32[1,128], index: 12, kind: input, shape index: {}]   ;;  %s5349_s13 = inlined_call_operand.hbm [shape: f32[2,1,128], index: 13, kind: output, shape index: {}]  }
   0x1   :  { %5365 = sst [smem:[#allocation5_spill]] %s5336_s0 }
   0x2   :  { %5366 = sst [smem:[#allocation6_spill]] %s5337_s1 }
   0x3   :  { %5367 = sst [smem:[#allocation7_spill]] %s5338_s2 }
   0x4   :  { %18 = vsyncpa [#allocation3], 0 }
   0x5   :  { %20 = vsyncpa [#allocation3 + $0x1], 0  ;;  %s4143_s25 = smov 0   ;;  %s4145_s26 = smov 0  }
   0x6   :  { %s4147_s27 = smov 0   ;;  %s4149_s28 = smov 0  }
   0x7 LB: > { %s4164_s29 = sadd.s32 4294967295, %s4063_s28   ;;  %s3570_s30 = sadd.s32 4294967294, %s4063_s28   ;;  %s4063_s28 = sphi %s4149_s28, %s5440_s28   ;;  %s4059_s27 = sphi %s4147_s27, %s5439_s27   ;;  %s4055_s26 = sphi %s4145_s26, %s5438_s26   ;;  %s4051_s25 = sphi %s4143_s25, %s5437_s25  }
   0x8   : > { %s4168_s14 = sadd.s32 1, %s4063_s28   ;;  %s316_s15 = sadd.s32 1, %s4059_s27 }
   0x9   : > { %s313_s16 = ssub.s32 %s4063_s28, %s4168_s14  ;;  %p326_p0 = scmp.ne.s32.totalorder %s4059_s27, %s4055_s26 }
   0xa   : > { %p314_p1 = scmp.eq.s32.totalorder %s313_s16, 0  ;;  %p327_p2 = scmp.eq.s32.totalorder %s4164_s29, 1 }
   0xb   : > { %p332_p3 = scmp.ne.s32.totalorder %s4055_s26, %s4051_s25  ;;  %p333_p4 = scmp.eq.s32.totalorder %s3570_s30, 1 }
   0xc   : > { %s4179_s17 = scalar_select %p314_p1, %s4059_s27, %s316_s15  }
   0xd   : > { %p4181_p5 = por %p327_p2, %p326_p0  ;;  %p4185_p6 = por %p333_p4, %p332_p3 }
   0xe   : > { %p3573_p7 = scmp.ge.s32.totalorder %s4063_s28, 1  ;;  %p397_p8 = scmp.lt.s32.totalorder %s4063_s28, 3 }
  0x10   : > { %p398_p9 = pnand %p3573_p7, %p397_p8 }
  0x11   : > { %s5370_s2 = sld [smem:[#allocation7_spill]] (!%p398_p9)  ;;  %vm599_vm0 = vcmask (!%p398_p9), 1045504   ;;  %p442_p10 = scmp.lt.s32.totalorder (!%p398_p9), %s4164_s29, 1  ;;  %v4065_v1 = vmov (!%p398_p9), 0.0   ;;  %vm5351_vm1 = vmmov (!%p398_p9), 0   ;;  %v674_v2 = vld [vmem:[%s5339_s3] sm:$0xff] (!%p398_p9)  ;;  %v456_v10 = vlaneseq (!%p398_p9) }
  0x12   : > { %401 = sbr.rel (%p398_p9) target bundleno = 4171 (0x104b), region = 72  ;;  %3664 = vmatprep.subr.mxu1 (!%p398_p9), %v4065_v1  ;;  %3666 = vmatprep.mubr.msk.f32.mxu1 (!%p398_p9), %vm5351_vm1, %v4065_v1  ;;  %v675_v3 = vld [vmem:[%s5339_s3 + $0x8] sm:$0xff] (!%p398_p9)  ;;  %v4067_v4 = vmov (!%p398_p9), 0.0|0.0   ;;  %vm596_vm2 = vcmask (!%p398_p9), 48128   ;;  %s5371_s0 = sld [smem:[#allocation5_spill]] (!%p398_p9)  ;;  %v676_v7 = vld [vmem:[%s5339_s3 + $0x10] sm:$0xff] (!%p398_p9) }
  0x13   : > { %3680 = vmatprep.subr.mxu0 (!%p398_p9), %v4065_v1  ;;  %3682 = vmatprep.mubr.msk.f32.mxu0 (!%p398_p9), %vm5351_vm1, %v4065_v1  ;;  %v3795_v5 = vpack.c.bf16 (!%p398_p9), %v675_v3, %v674_v2  ;;  %v677_v8 = vld [vmem:[%s5339_s3 + $0x18] sm:$0xff] (!%p398_p9)  ;;  %v4229_v11 = vshrl.u32 (!%p398_p9), %v456_v10, 7  ;;  %v590_v13 = vld [vmem:[%s5340_s4] sm:$0x3] (!%p398_p9)  ;;  %v832_v16 = vld [vmem:[%s5341_s5 + $0x8] sm:$0xff] (!%p398_p9)  ;;  %vm5350_vm3 = vcmask (!%p398_p9), 261120  }
  0x14   : > { %v3798_v9 = vpack.c.bf16 (!%p398_p9), %v677_v8, %v676_v7  ;;  %v831_v15 = vld [vmem:[%s5341_s5] sm:$0xff] (!%p398_p9)  ;;  %v833_v22 = vld [vmem:[%s5341_s5 + $0x10] sm:$0xff] (!%p398_p9)  ;;  %v834_v23 = vld [vmem:[%s5341_s5 + $0x18] sm:$0xff] (!%p398_p9)  ;;  %s5372_s1 = sld [smem:[#allocation6_spill]] (!%p398_p9)  ;;  %vm5359_vm4 = vcmask (!%p398_p9), 64512   ;;  %s5354_s24 = smov (!%p398_p9), 96  }
  0x15   : > { %v4232_v12 = vsub.s32 (!%p398_p9), 0, %v4229_v11  ;;  %v3801_v20 = vpack.c.bf16 (!%p398_p9), %v832_v16, %v831_v15  ;;  %v3804_v24 = vpack.c.bf16 (!%p398_p9), %v834_v23, %v833_v22  ;;  %v4256_v25 = vsub.s32 (!%p398_p9), 1, %v4229_v11  ;;  %v3580_v27 = vld [vmem:[%s5341_s5 + $0x20] sm:$0xff] (!%p398_p9)  ;;  %v3581_v28 = vld [vmem:[%s5341_s5 + $0x28] sm:$0xff] (!%p398_p9)  ;;  %v3582_v34 = vld [vmem:[%s5341_s5 + $0x30] sm:$0xff] (!%p398_p9)  ;;  %s5375_s20 = smov (!%p398_p9), 96  }
  0x16   : > { %v3807_v32 = vpack.c.bf16 (!%p398_p9), %v3581_v28, %v3580_v27  ;;  %v3583_v35 = vld [vmem:[%s5341_s5 + $0x38] sm:$0xff] (!%p398_p9)  ;;  %v4068_v38 = vmov (!%p398_p9), 1966171168   ;;  %v983_v55 = vld [vmem:[%s5342_s6] sm:$0x3] (!%p398_p9)  ;;  %vm557_vm5 = vcmask (!%p398_p9), 15360  }
  0x17   : > { %v591_v0 = vld [vmem:[%s5370_s2] sm:$0x3f] (!%p398_p9)  ;;  %v595_v14 = vrot.slane (!%p398_p9), %v590_v13, %v4232_v12  ;;  %v681_v26 = vrot.slane (!%p398_p9), %v590_v13, %v4256_v25  ;;  %v3810_v36 = vpack.c.bf16 (!%p398_p9), %v3583_v35, %v3582_v34  ;;  %v454_v39 = vunpack.c.l.s4 (!%p398_p9), %v4068_v38  ;;  %s3603_s23 = sshll.u32 (!%p398_p9), %s4164_s29, 4 }
  0x18   : > { %3665 = vmatpush3.msk.msra.mxu1 (!%p398_p9), %vm599_vm0, %v591_v0  ;;  %v1101_v63 = vrot.slane (!%p398_p9), %v983_v55, %v4232_v12  ;;  %vm1184_vm10 = vcmask (!%p398_p9), 1041409   ;;  %vm1186_vm11 = vcmask (!%p398_p9), 1042434   ;;  %vm5364_vm14 = vcmask (!%p398_p9), 1043459  }
  0x19   : > { %s4205_s15 = scalar_select %p442_p10, %s4164_s29, 1  ;;  %3794 = vmatprep.subr.bf16.mxu1 %v4067_v4  ;;  %v455_v42 = vunpack.c.0.s8 %v454_v39  ;;  %vm5361_vm0 = vcmask 1044484  }
  0x1a   : > { %s4072_s29 = smov [#allocation2]  }
  0x1b   : > { %s3574_s16 = sshll.u32 %s4205_s15, 3  ;;  %v4295_v43 = vsub.s32 %v455_v42, %v4229_v11 }
  0x1c   : > { %s445_s22 = scalar_lea.vmem %s5371_s0, %s3574_s16  ;;  %s4071_s0 = smov 32  }
  0x1d   : > { %v4215_v6 = vld [vmem:[%s445_s22] sm:$0xff]  ;;  %s4284_s22 = scalar_lea.vmem %s5372_s1, %s4205_s15  ;;  %s4005_s15 = sshll.u32 %s4072_s29, 4  ;;  %s4006_s15 = int_to_ptr.vmem [resolvable:$false] %s4005_s15 }
  0x1e   : > { %3667 = vmatmul.mubr.msk.f32.vlgmr.msra.gmra.mrb[0].mxu1 %vm596_vm2, %v4215_v6  ;;  %v450_v37 = vld [vmem:[%s4284_s22] sm:$0x1]  ;;  %s4007_s1 = scalar_lea.vmem %s4006_s15, 32 }
  0x1f   : > { %3796 = vmatpush3.bf16.msra.mxu1 %v3795_v5  ;;  %3677 = vmatprep.mubr.msk.f32.mxu1 %vm5351_vm1, %v4065_v1 }
  0x20   : > { %3797 = vmatprep.subr.bf16.mxu1 %v4067_v4 }
  0x23   : > { %3799 = vmatpush3.bf16.msra.mxu1 %v3798_v9 }
  0x24   : > { %3800 = vmatprep.subr.bf16.mxu1 %v4067_v4 }
  0xf1   : > { %v669_v17 = vpop.f32.mrb[0].mxu1 }
  0xf2   : > { %v670_v18 = vadd.f32 %v669_v17, %v595_v14  ;;  %v3668_v19 = vpop.f32.mrb[1].mxu1 }
  0xf4   : > { %v673_v21 = vmax.f32 %v670_v18, 0.0 }
  0xf6   : > { %3678 = vmatmul.mubr.msk.f32.vlgmr.msra.gmra.mrb[2].mxu1 %vm5350_vm3, %v673_v21 }
  0xf7   : > { %3802 = vmatpush3.bf16.msra.mxu1 %v3801_v20  ;;  %3693 = vmatprep.mubr.msk.f32.mxu1 %vm5351_vm1, %v4065_v1 }
  0xf8   : > { %3803 = vmatprep.subr.bf16.mxu1 %v4067_v4 }
  0xfb   : > { %3805 = vmatpush3.bf16.msra.mxu1 %v3804_v24 }
  0xfc   : > { %3806 = vmatprep.subr.bf16.mxu1 %v4067_v4 }
 0x1c9   : > { %v752_v29 = vpop.f32.mrb[2].mxu1 }
 0x1ca   : > { %v753_v30 = vadd.f32 %v752_v29, %v681_v26  ;;  %v3679_v31 = vpop.f32.mrb[3].mxu1 }
 0x1cc   : > { %v756_v33 = vmax.f32 %v753_v30, 0.0 }
 0x1ce   : > { %3681 = vmatpush3.msra.mxu0 %v756_v33  ;;  %3694 = vmatmul.mubr.msk.f32.vlgmr.msra.gmra.mrb[4].mxu1 %vm5350_vm3, %v756_v33 }
 0x1cf   : > { %3808 = vmatpush3.bf16.msra.mxu1 %v3807_v32  ;;  %3704 = vmatprep.mubr.msk.f32.mxu1 %vm5351_vm1, %v4065_v1 }
 0x1d0   : > { %3809 = vmatprep.subr.bf16.mxu1 %v4067_v4  ;;  %3707 = vmatprep.subr.mxu0 %v4065_v1 }
 0x1d1   : > { %3683 = vmatmul.mubr.msk.f32.vlgmr.msra.gmra.mrb[0].mxu0 %vm5359_vm4, %v450_v37 }
 0x1d2   : > { %3709 = vmatprep.mubr.msk.f32.mxu0 %vm5351_vm1, %v4065_v1 }
 0x1d3   : > { %3811 = vmatpush3.bf16.msra.mxu1 %v3810_v36 }
 0x1d4   : > { %3712 = vmatprep.subr.mxu1 %v4065_v1 }
 0x1d6   : > { %3705 = vmatmul.mubr.msk.f32.vlgmr.msra.gmra.mrb[6].mxu1 %vm5350_vm3, %v756_v33 }
 0x1d7   : > { %3714 = vmatprep.mubr.msk.f32.mxu1 %vm5351_vm1, %v4065_v1  ;;  %vm5356_vm1 = vcmask 1047559  }
 0x2a1   : > { %v4290_v40 = vpop.f32.mrb[4].mxu1 }
 0x2a2   : > { %v3695_v41 = vpop.f32.mrb[5].mxu1  ;;  %3708 = vmatpush3.msra.mxu0 %v4290_v40 }
 0x2a3   : > { %3717 = vmatprep.subr.mxu0 %v4065_v1 }
 0x2a9   : > { %v979_v44 = vpop.f32.mrb[6].mxu1 }
 0x2aa   : > { %v985_v45 = vcombine.high %v979_v44, %v979_v44  ;;  %v992_v46 = vrot.slane %v979_v44, %v4295_v43  ;;  %v3706_v47 = vpop.f32.mrb[7].mxu1 }
 0x2ac   : > { %v999_v48 = vrot.slane %v985_v45, %v4295_v43  ;;  %v1000_v49 = vcombine.high %v992_v46, %v992_v46  ;;  %v1008_v50 = vrot.slane %v992_v46, %v4295_v43  ;;  %v459_v46 = vrot.slane %v4215_v6, %v4295_v43 }
 0x2ae   : > { %v1001_v51 = vcombine.high %v999_v48, %v999_v48  ;;  %v1015_v52 = vrot.slane %v999_v48, %v4295_v43  ;;  %v1022_v53 = vrot.slane %v1000_v49, %v4295_v43  ;;  %v1030_v54 = vcombine.high %v1008_v50, %v1008_v50 }
 0x2af   : > { %v1037_v56 = vrot.slane %v1008_v50, %v4232_v12  ;;  %v475_v47 = vrot.slane %v459_v46, %v4295_v43  ;;  %v467_v48 = vcombine.high %v459_v46, %v459_v46 }
 0x2b0   : > { %v1029_v57 = vrot.slane %v1001_v51, %v4295_v43  ;;  %v1031_v58 = vcombine.high %v1015_v52, %v1015_v52  ;;  %v1032_v59 = vcombine.high %v1022_v53, %v1022_v53  ;;  %v1041_v60 = vrot.slane %v1022_v53, %v4232_v12 }
 0x2b1   : > { %v1053_v61 = vrot.slane %v1015_v52, %v4232_v12  ;;  %v1074_v62 = vadd.f32 %v1037_v56, %v4290_v40  ;;  %v1045_v0 = vrot.slane %v1030_v54, %v4232_v12  ;;  %v497_v49 = vcombine.high %v475_v47, %v475_v47 }
 0x2b2   : > { %v1033_v2 = vcombine.high %v1029_v57, %v1029_v57  ;;  %v1049_v3 = vrot.slane %v1032_v59, %v4232_v12  ;;  %v1057_v5 = vrot.slane %v1029_v57, %v4232_v12  ;;  %v1061_v7 = vrot.slane %v1031_v58, %v4232_v12 }
 0x2b3   : > { %v1082_v8 = vmul.f32 0.2, %v1074_v62  ;;  %v1076_v9 = vadd.f32 %v1045_v0, %v4290_v40  ;;  %v1075_v13 = vadd.f32 %v1041_v60, %v4290_v40  ;;  %v1078_v14 = vadd.f32 %v1053_v61, %v4290_v40 }
 0x2b4   : > { %v1077_v15 = vadd.f32 %v1049_v3, %v4290_v40  ;;  %v1079_v16 = vadd.f32 %v1057_v5, %v4290_v40  ;;  %v1080_v17 = vadd.f32 %v1061_v7, %v4290_v40  ;;  %v1065_v18 = vrot.slane %v1033_v2, %v4232_v12 }
 0x2b5   : > { %v1090_v19 = vmax.f32 %v1074_v62, %v1082_v8  ;;  %v1084_v20 = vmul.f32 0.2, %v1076_v9  ;;  %v1083_v21 = vmul.f32 0.2, %v1075_v13  ;;  %v1086_v28 = vmul.f32 0.2, %v1078_v14 }
 0x2b6   : > { %v1085_v22 = vmul.f32 0.2, %v1077_v15  ;;  %v1081_v23 = vadd.f32 %v1065_v18, %v4290_v40  ;;  %v1087_v31 = vmul.f32 0.2, %v1079_v16  ;;  %v1088_v34 = vmul.f32 0.2, %v1080_v17 }
 0x2b7   : > { %v4323_v24 = vmul.f32 %v1101_v63, %v1090_v19  ;;  %v1092_v26 = vmax.f32 %v1076_v9, %v1084_v20  ;;  %v1091_v27 = vmax.f32 %v1075_v13, %v1083_v21  ;;  %v1094_v33 = vmax.f32 %v1078_v14, %v1086_v28 }
 0x2b8   : > { %v1093_v30 = vmax.f32 %v1077_v15, %v1085_v22  ;;  %v1095_v36 = vmax.f32 %v1079_v16, %v1087_v31  ;;  %v1089_v37 = vmul.f32 0.2, %v1081_v23  ;;  %v1096_v39 = vmax.f32 %v1080_v17, %v1088_v34 }
 0x2b9   : > { %1543 = vrot.lane.b32.xlu0 %v4323_v24, %s5354_s24  ;;  %v4327_v29 = vmul.f32 %v1101_v63, %v1092_v26  ;;  %v4331_v32 = vmul.f32 %v1101_v63, %v1091_v27  ;;  %v4339_v38 = vmul.f32 %v1101_v63, %v1094_v33  ;;  %v504_v50 = vrot.slane %v475_v47, %v4232_v12 }
 0x2ba   : > { %v4335_v35 = vmul.f32 %v1101_v63, %v1093_v30  ;;  %v4343_v41 = vmul.f32 %v1101_v63, %v1095_v36  ;;  %v1097_v42 = vmax.f32 %v1081_v23, %v1089_v37  ;;  %v4347_v44 = vmul.f32 %v1101_v63, %v1096_v39 }
 0x2bb   : > { %1547 = vrot.lane.b32.xlu1 %v4327_v29, %s5354_s24  ;;  %v489_v51 = vrot.slane %v467_v48, %v4295_v43  ;;  %v452_v52 = vcombine.high %v4215_v6, %v4215_v6  ;;  %v512_v53 = vrot.slane %v497_v49, %v4232_v12  ;;  %v541_v54 = vsub.f32 %v504_v50, %v4215_v6 }
 0x2bc   : > { %v4351_v45 = vmul.f32 %v1101_v63, %v1097_v42 }
 0x2bd   : > { %1545 = vrot.lane.b32.xlu0 %v4331_v32, %s5354_s24  ;;  %v499_v55 = vcombine.high %v489_v51, %v489_v51  ;;  %v466_v56 = vrot.slane %v452_v52, %v4295_v43  ;;  %v543_v57 = vsub.f32 %v512_v53, %v4215_v6  ;;  %v508_v58 = vrot.slane %v489_v51, %v4232_v12 }
 0x2be   : > { %v549_v59 = vmul.f32 %v541_v54, %v541_v54 }
 0x2bf   : > { %1549 = vrot.lane.b32.xlu1 %v4335_v35, %s5354_s24  ;;  %v516_v60 = vrot.slane %v499_v55, %v4232_v12  ;;  %v482_v61 = vrot.slane %v466_v56, %v4295_v43  ;;  %v468_v62 = vcombine.high %v466_v56, %v466_v56  ;;  %v551_v63 = vmul.f32 %v543_v57, %v543_v57 }
 0x2c0   : > { %v542_v0 = vsub.f32 %v508_v58, %v4215_v6  ;;  %v558_v2 = vsel %vm557_vm5, %v549_v59, 0.0  ;;  %v1113_v56 = vsel %vm5350_vm3, %v4331_v32, 0.0  ;;  %v1119_v59 = vsel %vm5350_vm3, %v4335_v35, 0.0 }
 0x2c1   : > { %1551 = vrot.lane.b32.xlu0 %v4339_v38, %s5354_s24  ;;  %v544_v3 = vsub.f32 %v516_v60, %v4215_v6  ;;  %v520_v5 = vrot.slane %v482_v61, %v4232_v12  ;;  %v496_v7 = vrot.slane %v468_v62, %v4295_v43  ;;  %v564_v8 = vsel %vm557_vm5, %v551_v63, 0.0 }
 0x2c2   : > { %v550_v9 = vmul.f32 %v542_v0, %v542_v0  ;;  %v498_v16 = vcombine.high %v482_v61, %v482_v61  ;;  %v1125_v61 = vsel %vm5350_vm3, %v4343_v41, 0.0  ;;  %v1110_v62 = vsel %vm5350_vm3, %v4323_v24, 0.0 }
 0x2c3   : > { %1553 = vrot.lane.b32.xlu1 %v4343_v41, %s5354_s24  ;;  %v552_v13 = vmul.f32 %v544_v3, %v544_v3  ;;  %v545_v14 = vsub.f32 %v520_v5, %v4215_v6  ;;  %v524_v15 = vrot.slane %v496_v7, %v4232_v12  ;;  %v500_v31 = vcombine.high %v496_v7, %v496_v7 }
 0x2c4   : > { %v561_v17 = vsel %vm557_vm5, %v550_v9, 0.0  ;;  %v528_v21 = vrot.slane %v498_v16, %v4232_v12  ;;  %v1131_v32 = vsel %vm5350_vm3, %v4351_v45, 0.0  ;;  %v1116_v63 = vsel %vm5350_vm3, %v4327_v29, 0.0 }
 0x2c5   : > { %1555 = vrot.lane.b32.xlu0 %v4347_v44, %s5354_s24  ;;  %v567_v18 = vsel %vm557_vm5, %v552_v13, 0.0  ;;  %v553_v19 = vmul.f32 %v545_v14, %v545_v14  ;;  %v546_v20 = vsub.f32 %v524_v15, %v4215_v6  ;;  %v532_v33 = vrot.slane %v500_v31, %v4232_v12 }
 0x2c6   : > { %v547_v26 = vsub.f32 %v528_v21, %v4215_v6  ;;  %v1122_v35 = vsel %vm5350_vm3, %v4339_v38, 0.0  ;;  %v1128_v41 = vsel %vm5350_vm3, %v4347_v44, 0.0  ;;  %v1151_v44 = vand.u32 127, %v456_v10 }
 0x2c7   : > { %1557 = vrot.lane.b32.xlu1 %v4351_v45, %s5354_s24  ;;  %v570_v22 = vsel %vm557_vm5, %v553_v19, 0.0  ;;  %v554_v23 = vmul.f32 %v546_v20, %v546_v20  ;;  %v548_v34 = vsub.f32 %v532_v33, %v4215_v6 }
 0x2c8   : > { %v555_v28 = vmul.f32 %v547_v26, %v547_v26  ;;  %v4436_v16 = vsub.s32 %v1151_v44, %v4229_v11 }
 0x2c9   : > { %v573_v27 = vsel %vm557_vm5, %v554_v23, 0.0  ;;  %v556_v36 = vmul.f32 %v548_v34, %v548_v34 }
 0x2ca   : > { %v576_v30 = vsel %vm557_vm5, %v555_v28, 0.0 }
 0x2cb   : > { %v579_v46 = vsel %vm557_vm5, %v556_v36, 0.0  ;;  %vm5360_vm5 = vcmask 1045509  }
 0x2e4   : > { %559 = vadd.xlane.f32.xlu0 %v558_v2 }
 0x2e8   : > { %565 = vadd.xlane.f32.xlu0 %v564_v8 }
 0x2eb   : > { %562 = vadd.xlane.f32.xlu1 %v561_v17 }
 0x2ec   : > { %568 = vadd.xlane.f32.xlu0 %v567_v18 }
 0x2f0   : > { %571 = vadd.xlane.f32.xlu0 %v570_v22 }
 0x2f4   : > { %574 = vadd.xlane.f32.xlu0 %v573_v27 }
 0x2f8   : > { %577 = vadd.xlane.f32.xlu0 %v576_v30 }
 0x32b   : > { %v1544_v37 = vpop.permute.xlu0 %1543 }
 0x32c   : > { %v1567_v39 = vsel %vm5350_vm3, %v1544_v37, 0.0 }
 0x32d   : > { %v1548_v42 = vpop.permute.xlu1 %1547  ;;  %1568 = vadd.xlane.f32.xlu0 %v1567_v39 }
 0x32e   : > { %v1573_v50 = vsel %vm5350_vm3, %v1548_v42, 0.0 }
 0x32f   : > { %v1546_v47 = vpop.permute.xlu0 %1545 }
 0x330   : > { %v1570_v48 = vsel %vm5350_vm3, %v1546_v47, 0.0 }
 0x331   : > { %v1550_v49 = vpop.permute.xlu1 %1549  ;;  %1571 = vadd.xlane.f32.xlu1 %v1570_v48  ;;  %580 = vadd.xlane.f32.xlu0 %v579_v46 }
 0x332   : > { %v1576_v55 = vsel %vm5350_vm3, %v1550_v49, 0.0 }
 0x333   : > { %v1552_v51 = vpop.permute.xlu0 %1551 }
 0x334   : > { %v1579_v6 = vsel %vm5350_vm3, %v1552_v51, 0.0 }
 0x335   : > { %v1554_v52 = vpop.permute.xlu1 %1553  ;;  %1574 = vadd.xlane.f32.xlu1 %v1573_v50 }
 0x336   : > { %v1582_v57 = vsel %vm5350_vm3, %v1554_v52, 0.0 }
 0x337   : > { %v1556_v58 = vpop.permute.xlu0 %1555 }
 0x338   : > { %v1585_v60 = vsel %vm5350_vm3, %v1556_v58, 0.0 }
 0x339   : > { %v1558_v53 = vpop.permute.xlu1 %1557  ;;  %1580 = vadd.xlane.f32.xlu1 %v1579_v6 }
 0x33a   : > { %v1588_v54 = vsel %vm5350_vm3, %v1558_v53, 0.0  ;;  %vm5357_vm3 = vcmask 1046534  }
 0x33b   : > { %1589 = vadd.xlane.f32.xlu0 %v1588_v54 }
 0x33d   : > { %1577 = vadd.xlane.f32.xlu1 %v1576_v55 }
 0x33f   : > { %1114 = vadd.xlane.f32.xlu0 %v1113_v56 }
 0x341   : > { %1583 = vadd.xlane.f32.xlu1 %v1582_v57 }
 0x343   : > { %1120 = vadd.xlane.f32.xlu0 %v1119_v59 }
 0x345   : > { %1586 = vadd.xlane.f32.xlu1 %v1585_v60 }
 0x347   : > { %1126 = vadd.xlane.f32.xlu0 %v1125_v61 }
 0x349   : > { %1111 = vadd.xlane.f32.xlu1 %v1110_v62 }
 0x34b   : > { %1132 = vadd.xlane.f32.xlu0 %v1131_v32 }
 0x34d   : > { %1117 = vadd.xlane.f32.xlu1 %v1116_v63 }
 0x351   : > { %1123 = vadd.xlane.f32.xlu1 %v1122_v35 }
 0x355   : > { %1129 = vadd.xlane.f32.xlu1 %v1128_v41 }
 0x371   : > { %v4412_v0 = vpop.xlane.xlu0 %559 }
 0x372   : > { %vm582_vm8 = vcmp.le.f32.partialorder %v4412_v0, 0.49 }
 0x375   : > { %v4414_v24 = vpop.xlane.xlu0 %565 }
 0x376   : > { %vm584_vm7 = vcmp.le.f32.partialorder %v4414_v24, 0.49 }
 0x378   : > { %v4424_v5 = vpop.xlane.xlu1 %562 }
 0x379   : > { %v4416_v2 = vpop.xlane.xlu0 %568  ;;  %vm583_vm6 = vcmp.le.f32.partialorder %v4424_v5, 0.49 }
 0x37a   : > { %vm585_vm9 = vcmp.le.f32.partialorder %v4416_v2, 0.49 }
 0x37d   : > { %v4418_v45 = vpop.xlane.xlu0 %571 }
 0x37e   : > { %vm586_vm12 = vcmp.le.f32.partialorder %v4418_v45, 0.49 }
 0x381   : > { %v4420_v3 = vpop.xlane.xlu0 %574 }
 0x382   : > { %vm5363_vm13 = vcmp.le.f32.partialorder %v4420_v3, 0.49 }
 0x385   : > { %v4422_v29 = vpop.xlane.xlu0 %577 }
 0x386   : > { %vm5362_vm2 = vcmp.le.f32.partialorder %v4422_v29, 0.49 }
 0x3ba   : > { %v1569_v38 = vpop.xlane.xlu0 %1568 }
 0x3bb   : > { %v4446_v10 = vsel %vm582_vm8, %v1569_v38, -1e+30 }
 0x3bc   : > { %v1610_v22 = vrot.slane %v4446_v10, %v4436_v16 }
 0x3be   : > { %v1572_v7 = vpop.xlane.xlu1 %1571  ;;  %v4426_v9 = vpop.xlane.xlu0 %580 }
 0x3bf   : > { %v4433_v14 = vsel %vm583_vm6, %v1572_v7, -1e+30  ;;  %vm5353_vm15 = vcmp.le.f32.partialorder %v4426_v9, 0.49 }
 0x3c0   : > { %v1614_v19 = vrot.slane %v4433_v14, %v4436_v16 }
 0x3c2   : > { %v1575_v8 = vpop.xlane.xlu1 %1574  ;;  %v1639_v28 = vsel %vm1184_vm10, %v1614_v19, %v1610_v22 }
 0x3c3   : > { %v4441_v17 = vsel %vm584_vm7, %v1575_v8, -1e+30 }
 0x3c4   : > { %v1618_v21 = vrot.slane %v4441_v17, %v4436_v16 }
 0x3c6   : > { %v1581_v13 = vpop.xlane.xlu1 %1580  ;;  %v1640_v33 = vsel %vm1186_vm11, %v1618_v21, %v1639_v28 }
 0x3c7   : > { %v4466_v30 = vsel %vm586_vm12, %v1581_v13, -1e+30 }
 0x3c8   : > { %v1590_v15 = vpop.xlane.xlu0 %1589  ;;  %v1626_v37 = vrot.slane %v4466_v30, %v4436_v16 }
 0x3c9   : > { %v4481_v39 = vsel %vm5353_vm15, %v1590_v15, -1e+30 }
 0x3ca   : > { %v1578_v18 = vpop.xlane.xlu1 %1577  ;;  %v1638_v50 = vrot.slane %v4481_v39, %v4436_v16 }
 0x3cb   : > { %v4452_v20 = vsel %vm585_vm9, %v1578_v18, -1e+30 }
 0x3cc   : > { %v1622_v23 = vrot.slane %v4452_v20, %v4436_v16  ;;  %v1115_v26 = vpop.xlane.xlu0 %1114 }
 0x3cd   : > { %v4501_v55 = vsel %vm583_vm6, %v1115_v26, -1e+30 }
 0x3ce   : > { %v1584_v27 = vpop.xlane.xlu1 %1583  ;;  %v1641_v34 = vsel %vm5364_vm14, %v1622_v23, %v1640_v33  ;;  %v1159_v60 = vrot.slane %v4501_v55, %v4436_v16 }
 0x3cf   : > { %v4470_v31 = vsel %vm5363_vm13, %v1584_v27, -1e+30  ;;  %v1642_v49 = vsel %vm5361_vm0, %v1626_v37, %v1641_v34  ;;  %v4070_v37 = vmov 0  }
 0x3d0   : > { %v1630_v36 = vrot.slane %v4470_v31, %v4436_v16  ;;  %v1121_v46 = vpop.xlane.xlu0 %1120  ;;  %3925 = vset.pattern.permute.xlu0 %v4070_v37  ;;  %3924 = vset.pattern.permute.xlu1 %v4070_v37 }
 0x3d1   : > { %v4514_v62 = vsel %vm585_vm9, %v1121_v46, -1e+30  ;;  %v4550_v46 = vsub.s32 3, %v4229_v11 }
 0x3d2   : > { %v1587_v42 = vpop.xlane.xlu1 %1586  ;;  %v1643_v51 = vsel %vm5360_vm5, %v1630_v36, %v1642_v49  ;;  %v1167_v38 = vrot.slane %v4514_v62, %v4436_v16 }
 0x3d3   : > { %v4485_v47 = vsel %vm5362_vm2, %v1587_v42, -1e+30  ;;  %v4547_v42 = vsub.s32 2, %v4229_v11 }
 0x3d4   : > { %v1634_v48 = vrot.slane %v4485_v47, %v4436_v16  ;;  %v1127_v57 = vpop.xlane.xlu0 %1126 }
 0x3d5   : > { %v4526_v44 = vsel %vm5363_vm13, %v1127_v57, -1e+30 }
 0x3d6   : > { %v1112_v52 = vpop.xlane.xlu1 %1111  ;;  %v1644_v6 = vsel %vm5357_vm3, %v1634_v48, %v1643_v51  ;;  %v1175_v22 = vrot.slane %v4526_v44, %v4436_v16 }
 0x3d7   : > { %v4496_v53 = vsel %vm582_vm8, %v1112_v52, -1e+30  ;;  %v1645_v54 = vsel %vm5356_vm1, %v1638_v50, %v1644_v6  ;;  %v4556_v52 = vsub.s32 4, %v4229_v11 }
 0x3d8   : > { %v1647_v56 = vsel %vm5359_vm4, %v1645_v54, -inf  ;;  %v1155_v58 = vrot.slane %v4496_v53, %v4436_v16  ;;  %v1133_v7 = vpop.xlane.xlu0 %1132 }
 0x3d9   : > { %1648 = vmax.xlane.f32.xlu1 %v1647_v56  ;;  %v4532_v18 = vsel %vm5353_vm15, %v1133_v7, -1e+30  ;;  %vm5373_vm15 = vmmov 0  }
 0x3da   : > { %v1118_v59 = vpop.xlane.xlu1 %1117  ;;  %v1185_v63 = vsel %vm1184_vm10, %v1159_v60, %v1155_v58  ;;  %v1183_v27 = vrot.slane %v4532_v18, %v4436_v16  ;;  %v4563_v60 = vsub.s32 5, %v4229_v11 }
 0x3db   : > { %v4510_v61 = vsel %vm584_vm7, %v1118_v59, -1e+30 }
 0x3dc   : > { %v1163_v32 = vrot.slane %v4510_v61, %v4436_v16 }
 0x3de   : > { %v1187_v35 = vsel %vm1186_vm11, %v1163_v32, %v1185_v63  ;;  %v1124_v41 = vpop.xlane.xlu1 %1123 }
 0x3df   : > { %v1138_v8 = vsel %vm586_vm12, %v1124_v41, -1e+30  ;;  %v1189_v15 = vsel %vm5364_vm14, %v1167_v38, %v1187_v35  ;;  %v4568_v41 = vsub.s32 6, %v4229_v11  ;;  %v4573_v38 = vsub.s32 7, %v4229_v11 }
 0x3e0   : > { %v1171_v13 = vrot.slane %v1138_v8, %v4436_v16 }
 0x3e2   : > { %v1191_v19 = vsel %vm5361_vm0, %v1171_v13, %v1189_v15  ;;  %v1130_v21 = vpop.xlane.xlu1 %1129 }
 0x3e3   : > { %v1140_v23 = vsel %vm5362_vm2, %v1130_v21, -1e+30  ;;  %v1193_v28 = vsel %vm5360_vm5, %v1175_v22, %v1191_v19 }
 0x3e4   : > { %v1179_v26 = vrot.slane %v1140_v23, %v4436_v16 }
 0x3e6   : > { %v1195_v33 = vsel %vm5357_vm3, %v1179_v26, %v1193_v28 }
 0x3e7   : > { %v1197_v34 = vsel %vm5356_vm1, %v1183_v27, %v1195_v33 }
 0x3e8   : > { %v1199_v36 = vsel %vm5359_vm4, %v1197_v34, -inf }
 0x3e9   : > { %1200 = vmax.xlane.f32.xlu0 %v1199_v36 }
 0x466   : > { %v1649_v48 = vpop.xlane.xlu1 %1648 }
 0x467   : > { %v1654_v49 = vrot.slane %v1649_v48, %v4232_v12  ;;  %v1658_v50 = vrot.slane %v1649_v48, %v4256_v25  ;;  %v1662_v51 = vrot.slane %v1649_v48, %v4547_v42  ;;  %v1666_v6 = vrot.slane %v1649_v48, %v4550_v46 }
 0x468   : > { %v1670_v32 = vrot.slane %v1649_v48, %v4556_v52  ;;  %v1678_v7 = vrot.slane %v1649_v48, %v4568_v41  ;;  %v1682_v26 = vrot.slane %v1649_v48, %v4573_v38 }
 0x469   : > { %v1691_v54 = vsub.f32 %v4446_v10, %v1654_v49  ;;  %v1692_v56 = vsub.f32 %v4433_v14, %v1658_v50  ;;  %v1693_v57 = vsub.f32 %v4441_v17, %v1662_v51  ;;  %v1694_v35 = vsub.f32 %v4452_v20, %v1666_v6 }
 0x46a   : > { %v1674_v10 = vrot.slane %v1649_v48, %v4563_v60  ;;  %v1695_v17 = vsub.f32 %v4466_v30, %v1670_v32 }
 0x46b   : > { %v1699_v58 = vmul.f32 1.442695, %v1691_v54  ;;  %v1701_v59 = vmul.f32 1.442695, %v1692_v56  ;;  %v1703_v63 = vmul.f32 1.442695, %v1693_v57 }
 0x46c   : > { %v1705_v14 = vmul.f32 1.442695, %v1694_v35  ;;  %v1707_v13 = vmul.f32 1.442695, %v1695_v17  ;;  %v1696_v15 = vsub.f32 %v4470_v31, %v1674_v10  ;;  %v1697_v31 = vsub.f32 %v4485_v47, %v1678_v7 }
 0x46d   : > { %3927 = vpow2.f32 %v1699_v58 }
 0x46e   : > { %3929 = vpow2.f32 %v1701_v59  ;;  %v1709_v27 = vmul.f32 1.442695, %v1696_v15  ;;  %v1711_v48 = vmul.f32 1.442695, %v1697_v31 }
 0x46f   : > { %3931 = vpow2.f32 %v1703_v63 }
 0x470   : > { %3933 = vpow2.f32 %v1705_v14 }
 0x471   : > { %3935 = vpow2.f32 %v1707_v13 }
 0x472   : > { %3937 = vpow2.f32 %v1709_v27 }
 0x476   : > { %v1201_v20 = vpop.xlane.xlu0 %1200 }
 0x477   : > { %v4577_v19 = vpop.eup %3927  ;;  %v1214_v21 = vrot.slane %v1201_v20, %v4547_v42  ;;  %v1222_v30 = vrot.slane %v1201_v20, %v4556_v52  ;;  %v1230_v33 = vrot.slane %v1201_v20, %v4568_v41  ;;  %v1206_v37 = vrot.slane %v1201_v20, %v4232_v12 }
 0x478   : > { %v4580_v22 = vpop.eup %3929  ;;  %1724 = vperm.xlu1 %3924, %v4577_v19   ;;  %v1210_v47 = vrot.slane %v1201_v20, %v4256_v25  ;;  %v1226_v59 = vrot.slane %v1201_v20, %v4563_v60  ;;  %v1234_v10 = vrot.slane %v1201_v20, %v4573_v38 }
 0x479   : > { %v1245_v11 = vsub.f32 %v4510_v61, %v1214_v21  ;;  %1727 = vperm.xlu0 %3925, %v4580_v22   ;;  %v4588_v28 = vpop.eup %3931  ;;  %v1247_v34 = vsub.f32 %v1138_v8, %v1222_v30  ;;  %v1698_v61 = vsub.f32 %v4481_v39, %v1682_v26  ;;  %v1249_v50 = vsub.f32 %v1140_v23, %v1230_v33 }
 0x47a   : > { %v4594_v49 = vpop.eup %3933  ;;  %v1243_v8 = vsub.f32 %v4496_v53, %v1206_v37  ;;  %v1218_v39 = vrot.slane %v1201_v20, %v4550_v46  ;;  %v1244_v23 = vsub.f32 %v4501_v55, %v1210_v47  ;;  %v1248_v14 = vsub.f32 %v4526_v44, %v1226_v59 }
 0x47b   : > { %v1255_v36 = vmul.f32 1.442695, %v1245_v11  ;;  %v1259_v51 = vmul.f32 1.442695, %v1247_v34  ;;  %v1713_v6 = vmul.f32 1.442695, %v1698_v61  ;;  %v4599_v54 = vpop.eup %3935  ;;  %v1250_v13 = vsub.f32 %v4532_v18, %v1234_v10 }
 0x47c   : > { %1730 = vperm.xlu1 %3924, %v4588_v28   ;;  %v1263_v56 = vmul.f32 1.442695, %v1249_v50  ;;  %v1251_v57 = vmul.f32 1.442695, %v1243_v8  ;;  %v4604_v58 = vpop.eup %3937  ;;  %v1246_v32 = vsub.f32 %v4514_v62, %v1218_v39  ;;  %v1253_v63 = vmul.f32 1.442695, %v1244_v23 }
 0x47d   : > { %3939 = vpow2.f32 %v1255_v36  ;;  %v1261_v15 = vmul.f32 1.442695, %v1248_v14  ;;  %v1265_v44 = vmul.f32 1.442695, %v1250_v13 }
 0x47e   : > { %3941 = vpow2.f32 %v1711_v48  ;;  %v1257_v17 = vmul.f32 1.442695, %v1246_v32 }
 0x47f   : > { %3943 = vpow2.f32 %v1259_v51 }
 0x480   : > { %1733 = vperm.xlu1 %3924, %v4594_v49   ;;  %3945 = vpow2.f32 %v1713_v6 }
 0x481   : > { %3947 = vpow2.f32 %v1263_v56 }
 0x482   : > { %3949 = vpow2.f32 %v1251_v57 }
 0x483   : > { %3951 = vpow2.f32 %v1253_v63 }
 0x484   : > { %1736 = vperm.xlu1 %3924, %v4599_v54   ;;  %3953 = vpow2.f32 %v1257_v17 }
 0x485   : > { %3955 = vpow2.f32 %v1261_v15 }
 0x486   : > { %3957 = vpow2.f32 %v1265_v44 }
 0x487   : > { %v4607_v53 = vpop.eup %3939 }
 0x488   : > { %1739 = vperm.xlu1 %3924, %v4604_v58   ;;  %1282 = vperm.xlu0 %3925, %v4607_v53   ;;  %v4612_v35 = vpop.eup %3941 }
 0x489   : > { %v4615_v55 = vpop.eup %3943 }
 0x48a   : > { %v4620_v7 = vpop.eup %3945 }
 0x48b   : > { %v4623_v62 = vpop.eup %3947 }
 0x48c   : > { %1742 = vperm.xlu1 %3924, %v4612_v35   ;;  %1288 = vperm.xlu0 %3925, %v4615_v55   ;;  %v4627_v21 = vpop.eup %3949 }
 0x48d   : > { %v4630_v20 = vpop.eup %3951 }
 0x48e   : > { %v4633_v26 = vpop.eup %3953 }
 0x48f   : > { %v4636_v18 = vpop.eup %3955 }
 0x490   : > { %1745 = vperm.xlu1 %3924, %v4620_v7   ;;  %1294 = vperm.xlu0 %3925, %v4623_v62   ;;  %v4639_v30 = vpop.eup %3957 }
 0x494   : > { %1276 = vperm.xlu1 %3924, %v4627_v21  }
 0x498   : > { %1279 = vperm.xlu1 %3924, %v4630_v20  }
 0x49c   : > { %1285 = vperm.xlu1 %3924, %v4633_v26  }
 0x4a0   : > { %1291 = vperm.xlu1 %3924, %v4636_v18  }
 0x4a4   : > { %1297 = vperm.xlu1 %3924, %v4639_v30  }
 0x4f7   : > { %v1725_v11 = vpop.permute.xlu1 %1724 }
 0x4f8   : > { %v1728_v34 = vpop.permute.xlu0 %1727  ;;  %v1750_v37 = vrot.slane %v1725_v11, %v4436_v16 }
 0x4f9   : > { %v1754_v48 = vrot.slane %v1728_v34, %v4436_v16 }
 0x4fb   : > { %v1731_v27 = vpop.permute.xlu1 %1730  ;;  %v1779_v8 = vsel %vm1184_vm10, %v1754_v48, %v1750_v37 }
 0x4fc   : > { %v1758_v61 = vrot.slane %v1731_v27, %v4436_v16 }
 0x4fe   : > { %v1780_v56 = vsel %vm1186_vm11, %v1758_v61, %v1779_v8 }
 0x4ff   : > { %v1734_v31 = vpop.permute.xlu1 %1733 }
 0x500   : > { %v1762_v50 = vrot.slane %v1734_v31, %v4436_v16 }
 0x502   : > { %v1781_v23 = vsel %vm5364_vm14, %v1762_v50, %v1780_v56 }
 0x503   : > { %v1737_v33 = vpop.permute.xlu1 %1736 }
 0x504   : > { %v1766_v51 = vrot.slane %v1737_v33, %v4436_v16 }
 0x506   : > { %v1782_v57 = vsel %vm5361_vm0, %v1766_v51, %v1781_v23 }
 0x507   : > { %v1740_v36 = vpop.permute.xlu1 %1739  ;;  %v1283_v15 = vpop.permute.xlu0 %1282 }
 0x508   : > { %v1770_v6 = vrot.slane %v1740_v36, %v4436_v16  ;;  %v1310_v34 = vrot.slane %v1283_v15, %v4436_v16 }
 0x50a   : > { %v1783_v63 = vsel %vm5360_vm5, %v1770_v6, %v1782_v57 }
 0x50b   : > { %v1743_v47 = vpop.permute.xlu1 %1742  ;;  %v1289_v31 = vpop.permute.xlu0 %1288 }
 0x50c   : > { %v1774_v39 = vrot.slane %v1743_v47, %v4436_v16  ;;  %v1318_v50 = vrot.slane %v1289_v31, %v4436_v16 }
 0x50e   : > { %v1784_v10 = vsel %vm5357_vm3, %v1774_v39, %v1783_v63 }
 0x50f   : > { %v1746_v59 = vpop.permute.xlu1 %1745  ;;  %v1295_v47 = vpop.permute.xlu0 %1294 }
 0x510   : > { %v1778_v32 = vrot.slane %v1746_v59, %v4436_v16  ;;  %v1326_v39 = vrot.slane %v1295_v47, %v4436_v16 }
 0x512   : > { %v1785_v14 = vsel %vm5356_vm1, %v1778_v32, %v1784_v10 }
 0x513   : > { %v1277_v17 = vpop.permute.xlu1 %1276  ;;  %v1787_v13 = vsel %vm5359_vm4, %v1785_v14, 0.0 }
 0x514   : > { %1788 = vadd.xlane.f32.xlu0 %v1787_v13  ;;  %v1302_v11 = vrot.slane %v1277_v17, %v4436_v16 }
 0x517   : > { %v1280_v44 = vpop.permute.xlu1 %1279 }
 0x518   : > { %v1306_v27 = vrot.slane %v1280_v44, %v4436_v16 }
 0x51a   : > { %v1331_v33 = vsel %vm1184_vm10, %v1306_v27, %v1302_v11 }
 0x51b   : > { %v1286_v36 = vpop.permute.xlu1 %1285  ;;  %v1332_v48 = vsel %vm1186_vm11, %v1310_v34, %v1331_v33 }
 0x51c   : > { %v1314_v37 = vrot.slane %v1286_v36, %v4436_v16 }
 0x51e   : > { %v1333_v61 = vsel %vm5364_vm14, %v1314_v37, %v1332_v48 }
 0x51f   : > { %v1292_v51 = vpop.permute.xlu1 %1291  ;;  %v1334_v6 = vsel %vm5361_vm0, %v1318_v50, %v1333_v61 }
 0x520   : > { %v1322_v8 = vrot.slane %v1292_v51, %v4436_v16 }
 0x522   : > { %v1335_v56 = vsel %vm5360_vm5, %v1322_v8, %v1334_v6 }
 0x523   : > { %v1298_v23 = vpop.permute.xlu1 %1297  ;;  %v1336_v59 = vsel %vm5357_vm3, %v1326_v39, %v1335_v56 }
 0x524   : > { %v1330_v57 = vrot.slane %v1298_v23, %v4436_v16 }
 0x526   : > { %v1337_v32 = vsel %vm5356_vm1, %v1330_v57, %v1336_v59 }
 0x527   : > { %v1339_v63 = vsel %vm5359_vm4, %v1337_v32, 0.0 }
 0x528   : > { %1340 = vadd.xlane.f32.xlu1 %v1339_v63 }
 0x5a1   : > { %v1789_v10 = vpop.xlane.xlu0 %1788 }
 0x5a2   : > { %3959 = vrcp.f32 %v1789_v10 }
 0x5ac   : > { %v3960_v14 = vpop.eup %3959 }
 0x5ad   : > { %v1799_v17 = vrot.slane %v3960_v14, %v4256_v25  ;;  %v1795_v13 = vrot.slane %v3960_v14, %v4232_v12  ;;  %v1807_v11 = vrot.slane %v3960_v14, %v4550_v46  ;;  %v1803_v27 = vrot.slane %v3960_v14, %v4547_v42 }
 0x5ae   : > { %v1815_v34 = vrot.slane %v3960_v14, %v4563_v60  ;;  %v1811_v36 = vrot.slane %v3960_v14, %v4556_v52  ;;  %v1823_v48 = vrot.slane %v3960_v14, %v4573_v38  ;;  %v1819_v61 = vrot.slane %v3960_v14, %v4568_v41 }
 0x5af   : > { %v1833_v15 = vmul.f32 %v4580_v22, %v1799_v17  ;;  %v1832_v44 = vmul.f32 %v4577_v19, %v1795_v13  ;;  %v1835_v31 = vmul.f32 %v4594_v49, %v1807_v11  ;;  %v1834_v33 = vmul.f32 %v4588_v28, %v1803_v27 }
 0x5b0   : > { %v1837_v19 = vmul.f32 %v4604_v58, %v1815_v34  ;;  %v1836_v22 = vmul.f32 %v4599_v54, %v1811_v36  ;;  %v1839_v28 = vmul.f32 %v4620_v7, %v1823_v48  ;;  %v1838_v49 = vmul.f32 %v4612_v35, %v1819_v61 }
 0x5b1   : > { %1852 = vperm.xlu1 %3924, %v1833_v15   ;;  %1849 = vperm.xlu0 %3925, %v1832_v44  }
 0x5b5   : > { %v1341_v37 = vpop.xlane.xlu1 %1340  ;;  %1858 = vperm.xlu1 %3924, %v1835_v31   ;;  %1855 = vperm.xlu0 %3925, %v1834_v33  }
 0x5b6   : > { %3961 = vrcp.f32 %v1341_v37 }
 0x5b9   : > { %1864 = vperm.xlu1 %3924, %v1837_v19   ;;  %1861 = vperm.xlu0 %3925, %v1836_v22  }
 0x5bd   : > { %1870 = vperm.xlu1 %3924, %v1839_v28   ;;  %1867 = vperm.xlu0 %3925, %v1838_v49  }
 0x5c0   : > { %v3962_v50 = vpop.eup %3961 }
 0x5c1   : > { %1912 = vrot.lane.b32.xlu0 %v4290_v40, %s5354_s24  ;;  %v1347_v58 = vrot.slane %v3962_v50, %v4232_v12  ;;  %v1351_v54 = vrot.slane %v3962_v50, %v4256_v25  ;;  %v1355_v8 = vrot.slane %v3962_v50, %v4547_v42  ;;  %v1359_v7 = vrot.slane %v3962_v50, %v4550_v46  ;;  %s5294_s24 = scalar_lea.hbm %s5349_s13, %s3603_s23 }
 0x5c2   : > { %v1363_v40 = vrot.slane %v3962_v50, %v4556_v52  ;;  %v1367_v56 = vrot.slane %v3962_v50, %v4563_v60  ;;  %v1371_v39 = vrot.slane %v3962_v50, %v4568_v41  ;;  %v1375_v23 = vrot.slane %v3962_v50, %v4573_v38 }
 0x5c3   : > { %v1384_v51 = vmul.f32 %v4627_v21, %v1347_v58  ;;  %v1385_v47 = vmul.f32 %v4630_v20, %v1351_v54  ;;  %v1386_v35 = vmul.f32 %v4607_v53, %v1355_v8  ;;  %v1387_v6 = vmul.f32 %v4633_v26, %v1359_v7 }
 0x5c4   : > { %v1388_v21 = vmul.f32 %v4615_v55, %v1363_v40  ;;  %v1389_v20 = vmul.f32 %v4636_v18, %v1367_v56  ;;  %v1390_v53 = vmul.f32 %v4623_v62, %v1371_v39  ;;  %v1391_v26 = vmul.f32 %v4639_v30, %v1375_v23 }
 0x5c5   : > { %1401 = vperm.xlu1 %3924, %v1384_v51   ;;  %1404 = vperm.xlu0 %3925, %v1385_v47  }
 0x5c9   : > { %1407 = vperm.xlu1 %3924, %v1386_v35   ;;  %1410 = vperm.xlu0 %3925, %v1387_v6  }
 0x5cd   : > { %1413 = vperm.xlu1 %3924, %v1388_v21   ;;  %1416 = vperm.xlu0 %3925, %v1389_v20  }
 0x5d1   : > { %1419 = vperm.xlu1 %3924, %v1390_v53   ;;  %1422 = vperm.xlu0 %3925, %v1391_v26  }
 0x630   : > { %v1853_v57 = vpop.permute.xlu1 %1852  ;;  %v1850_v59 = vpop.permute.xlu0 %1849 }
 0x631   : > { %v1879_v32 = vrot.slane %v1853_v57, %v4436_v16  ;;  %v1875_v55 = vrot.slane %v1850_v59, %v4436_v16 }
 0x633   : > { %v1904_v14 = vsel %vm1184_vm10, %v1879_v32, %v1875_v55  ;;  %v4745_v55 = vpop.f32.mrb[0].mxu0 }
 0x634   : > { %v1859_v63 = vpop.permute.xlu1 %1858  ;;  %v1856_v18 = vpop.permute.xlu0 %1855 }
 0x635   : > { %v1883_v10 = vrot.slane %v1856_v18, %v4436_v16  ;;  %v1887_v17 = vrot.slane %v1859_v63, %v4436_v16  ;;  %v3684_v63 = vpop.f32.mrb[1].mxu0  ;;  %v2068_v18 = vld [vmem:[%s5343_s7] sm:$0xff] }
 0x637   : > { %v1905_v62 = vsel %vm1186_vm11, %v1883_v10, %v1904_v14  ;;  %v2069_v10 = vld [vmem:[%s5343_s7 + $0x8] sm:$0xff]  ;;  %v2070_v14 = vld [vmem:[%s5343_s7 + $0x10] sm:$0xff] }
 0x638   : > { %v1865_v13 = vpop.permute.xlu1 %1864  ;;  %v1862_v30 = vpop.permute.xlu0 %1861  ;;  %v1906_v11 = vsel %vm5364_vm14, %v1887_v17, %v1905_v62  ;;  %v3813_v17 = vpack.c.bf16 %v2069_v10, %v2068_v18  ;;  %v2071_v62 = vld [vmem:[%s5343_s7 + $0x18] sm:$0xff] }
 0x639   : > { %v1891_v15 = vrot.slane %v1862_v30, %v4436_v16  ;;  %v1895_v44 = vrot.slane %v1865_v13, %v4436_v16  ;;  %v3816_v13 = vpack.c.bf16 %v2071_v62, %v2070_v14  ;;  %v2072_v30 = vld [vmem:[%s5343_s7 + $0x20] sm:$0xff] }
 0x63b   : > { %v1907_v27 = vsel %vm5361_vm0, %v1891_v15, %v1906_v11  ;;  %v2073_v15 = vld [vmem:[%s5343_s7 + $0x28] sm:$0xff]  ;;  %v2074_v11 = vld [vmem:[%s5343_s7 + $0x30] sm:$0xff] }
 0x63c   : > { %v1871_v31 = vpop.permute.xlu1 %1870  ;;  %v1868_v33 = vpop.permute.xlu0 %1867  ;;  %v1908_v37 = vsel %vm5360_vm5, %v1895_v44, %v1907_v27  ;;  %v3819_v44 = vpack.c.bf16 %v2073_v15, %v2072_v30  ;;  %v2075_v27 = vld [vmem:[%s5343_s7 + $0x38] sm:$0xff]  ;;  %v4837_v15 = vld [vmem:[%s5344_s8] sm:$0x3] }
 0x63d   : > { %v1903_v34 = vrot.slane %v1871_v31, %v4436_v16  ;;  %v1899_v36 = vrot.slane %v1868_v33, %v4436_v16  ;;  %v3822_v31 = vpack.c.bf16 %v2075_v27, %v2074_v11 }
 0x63f   : > { %v1909_v19 = vsel %vm5357_vm3, %v1899_v36, %v1908_v37 }
 0x640   : > { %v1913_v22 = vpop.permute.xlu0 %1912  ;;  %v1910_v48 = vsel %vm5356_vm1, %v1903_v34, %v1909_v19  ;;  %v3999_v19 = vld [vmem:[%s5342_s6] sm:$0x3] }
 0x641   : > { %3713 = vmatpush3.msra.mxu1 %v1913_v22  ;;  %v1995_v22 = vrot.slane %v3999_v19, %v4256_v25  ;;  %v2347_v19 = vrot.slane %v4837_v15, %v4232_v12 }
 0x642   : > { %3715 = vmatmul.mubr.msk.f32.vlgmr.msra.gmra.mrb[8].mxu1 %vm5359_vm4, %v1910_v48  ;;  %3812 = vmatprep.subr.bf16.mxu1 %v4067_v4 }
 0x643   : > { %3738 = vmatprep.mubr.msk.f32.mxu1 %vm5373_vm15, %v4065_v1  ;;  %3814 = vmatpush3.bf16.msra.mxu1 %v3813_v17 }
 0x644   : > { %v1402_v61 = vpop.permute.xlu1 %1401  ;;  %v1405_v28 = vpop.permute.xlu0 %1404  ;;  %3815 = vmatprep.subr.bf16.mxu1 %v4067_v4 }
 0x645   : > { %v1427_v49 = vrot.slane %v1402_v61, %v4436_v16  ;;  %v1431_v50 = vrot.slane %v1405_v28, %v4436_v16  ;;  %v3589_v28 = vld [vmem:[%s5343_s7 + $0x40] sm:$0xff] }
 0x647   : > { %v1456_v47 = vsel %vm1184_vm10, %v1431_v50, %v1427_v49  ;;  %3817 = vmatpush3.bf16.msra.mxu1 %v3816_v13  ;;  %v3590_v49 = vld [vmem:[%s5343_s7 + $0x48] sm:$0xff] }
 0x648   : > { %v1408_v58 = vpop.permute.xlu1 %1407  ;;  %v1411_v54 = vpop.permute.xlu0 %1410  ;;  %3818 = vmatprep.subr.bf16.mxu1 %v4067_v4 }
 0x649   : > { %v1435_v51 = vrot.slane %v1408_v58, %v4436_v16  ;;  %v1439_v8 = vrot.slane %v1411_v54, %v4436_v16  ;;  %v3825_v54 = vpack.c.bf16 %v3590_v49, %v3589_v28 }
 0x64b   : > { %v1457_v7 = vsel %vm1186_vm11, %v1435_v51, %v1456_v47  ;;  %3820 = vmatpush3.bf16.msra.mxu1 %v3819_v44  ;;  %v3591_v51 = vld [vmem:[%s5343_s7 + $0x50] sm:$0xff]  ;;  %v3592_v47 = vld [vmem:[%s5343_s7 + $0x58] sm:$0xff] }
 0x64c   : > { %v1414_v35 = vpop.permute.xlu1 %1413  ;;  %v1417_v6 = vpop.permute.xlu0 %1416  ;;  %v1458_v56 = vsel %vm5364_vm14, %v1439_v8, %v1457_v7  ;;  %3821 = vmatprep.subr.bf16.mxu1 %v4067_v4  ;;  %v4795_v8 = vld [vmem:[%s4284_s22] sm:$0x1]  ;;  %v3828_v7 = vpack.c.bf16 %v3592_v47, %v3591_v51  ;;  %s440_s22 = sand.u32 1, %s4055_s26  }
 0x64d   : > { %v1443_v40 = vrot.slane %v1414_v35, %v4436_v16  ;;  %v1447_v21 = vrot.slane %v1417_v6, %v4436_v16  ;;  %v3593_v35 = vld [vmem:[%s5343_s7 + $0x60] sm:$0xff]  ;;  %v3594_v6 = vld [vmem:[%s5343_s7 + $0x68] sm:$0xff]  ;;  %s441_s30 = scalar_lea.vmem [#allocation2], %s440_s22  ;;  %s3494_s21 = scalar_lea.sflag [#allocation3], %s440_s22 }
 0x64e   : > { %s3506_s16 = sshll.u32 %s441_s30, 4  ;;  %s5296_s16 = int_to_ptr.vmem [resolvable:$true] %s3506_s16 }
 0x64f   : > { %v1459_v20 = vsel %vm5361_vm0, %v1443_v40, %v1458_v56  ;;  %3823 = vmatpush3.bf16.msra.mxu1 %v3822_v31  ;;  %v3831_v40 = vpack.c.bf16 %v3594_v6, %v3593_v35  ;;  %v3595_v56 = vld [vmem:[%s5343_s7 + $0x70] sm:$0xff]  ;;  %s4001_s2 = scalar_lea.vmem %s5296_s16, 16  ;;  %p4008_p0 = scmp.lt.s32.totalorder %s5296_s16, %s4006_s15 }
 0x650   : > { %v1420_v39 = vpop.permute.xlu1 %1419  ;;  %v1423_v23 = vpop.permute.xlu0 %1422  ;;  %v1460_v57 = vsel %vm5360_vm5, %v1447_v21, %v1459_v20  ;;  %3760 = vmatprep.subr.mxu1 %v4065_v1  ;;  %v3596_v21 = vld [vmem:[%s5343_s7 + $0x78] sm:$0xff]  ;;  %p4002_p11 = scmp.ne.s32.totalorder %s5296_s16, %s4001_s2  ;;  %p4009_p1 = scmp.lt.s32.totalorder %s4007_s1, %s4001_s2 }
 0x651   : > { %v1451_v53 = vrot.slane %v1420_v39, %v4436_v16  ;;  %v1455_v26 = vrot.slane %v1423_v23, %v4436_v16  ;;  %v3834_v20 = vpack.c.bf16 %v3596_v21, %v3595_v56 }
 0x652   : > { %p4003_p12 = pnand %p4002_p11, %p4181_p5  ;;  %p4010_p2 = por %p4009_p1, %p4008_p0 }
 0x653   : > { %v1461_v59 = vsel %vm5357_vm3, %v1451_v53, %v1460_v57  ;;  %vm5358_vm3 = vcmask 523264  }
 0x654   : > { %v1462_v32 = vsel %vm5356_vm1, %v1455_v26, %v1461_v59  ;;  %vm5374_vm1 = vcmask 261120   ;;  %p4004_p13 = pneg %p4003_p12 }
 0x655   : > { %3710 = vmatmul.mubr.msk.f32.vlgmr.msra.gmra.mrb[2].mxu0 %vm5359_vm4, %v1462_v32  ;;  %vm5378_vm5 = vmmov %vm5374_vm1 }
 0x656   : > { %3719 = vmatprep.mubr.msk.f32.mxu0 %vm5373_vm15, %v4065_v1  ;;  %vm5379_vm0 = vmmov %vm5374_vm1  ;;  %p4011_p3 = pnand %p4010_p2, %p4004_p13 }
 0x657   : > { %vm5381_vm2 = vmmov %vm5379_vm0 }
 0x658   : > { %vm5385_vm13 = vmmov %vm5379_vm0 }
 0x659   : > { %vm5388_vm14 = vmmov %vm5379_vm0 }
 0x715   : > { %v1983_v33 = vpop.f32.mrb[8].mxu1 }
 0x716   : > { %1988 = vrot.lane.b32.xlu1 %v1983_v33, %s4071_s0  ;;  %v3716_v34 = vpop.f32.mrb[9].mxu1 }
 0x728   : > { %v1531_v36 = vpop.f32.mrb[2].mxu0 }
 0x729   : > { %v3711_v37 = vpop.f32.mrb[3].mxu0 }
 0x788   : > { %v1989_v48 = vpop.permute.xlu1 %1988 }
 0x789   : > { %v1991_v61 = vsel %vm5374_vm1, %v1531_v36, %v1989_v48 }
 0x78a   : > { %v1996_v50 = vadd.f32 %v1995_v22, %v1991_v61 }
 0x78c   : > { %v1997_v58 = vmax.f32 %v1996_v50, 0.0 }
 0x78e   : > { %3718 = vmatpush3.msra.mxu0 %v1997_v58  ;;  %3739 = vmatmul.mubr.msk.f32.vlgmr.msra.gmra.mrb[10].mxu1 %vm5358_vm3, %v1997_v58 }
 0x78f   : > { %3720 = vmatmul.mubr.msk.f32.vlgmr.msra.gmra.mrb[4].mxu0 %vm5359_vm4, %v4795_v8  ;;  %3824 = vmatprep.subr.bf16.mxu0 %v4067_v4  ;;  %vm5377_vm4 = vmmov %vm5374_vm1 }
 0x790   : > { %3826 = vmatpush3.bf16.msra.mxu0 %v3825_v54  ;;  %3757 = vmatprep.mubr.msk.f32.mxu0 %vm5373_vm15, %v4065_v1 }
 0x791   : > { %3827 = vmatprep.subr.bf16.mxu0 %v4067_v4  ;;  %3762 = vmatprep.mubr.msk.f32.mxu1 %vm5373_vm15, %v4065_v1 }
 0x794   : > { %3829 = vmatpush3.bf16.msra.mxu0 %v3828_v7 }
 0x795   : > { %3830 = vmatprep.subr.bf16.mxu0 %v4067_v4 }
 0x798   : > { %3832 = vmatpush3.bf16.msra.mxu0 %v3831_v40 }
 0x799   : > { %3833 = vmatprep.subr.bf16.mxu0 %v4067_v4 }
 0x79c   : > { %3835 = vmatpush3.bf16.msra.mxu0 %v3834_v20 }
 0x79d   : > { %3765 = vmatprep.subr.mxu0 %v4065_v1 }
 0x79f   : > { %3758 = vmatmul.mubr.msk.f32.vlgmr.msra.gmra.mrb[6].mxu0 %vm5358_vm3, %v1997_v58  ;;  %vm5376_vm3 = vmmov %vm5374_vm1 }
 0x7a0   : > { %3767 = vmatprep.mubr.msk.f32.mxu0 %vm5373_vm15, %v4065_v1 }
 0x861   : > { %v4823_v39 = vpop.f32.mrb[10].mxu1 }
 0x862   : > { %v4825_v23 = vpop.f32.mrb[4].mxu0  ;;  %v3740_v53 = vpop.f32.mrb[11].mxu1  ;;  %3761 = vmatpush3.msra.mxu1 %v4823_v39 }
 0x863   : > { %v3721_v26 = vpop.f32.mrb[5].mxu0  ;;  %3770 = vmatprep.subr.mxu1 %v4065_v1 }
 0x872   : > { %v2225_v57 = vpop.f32.mrb[6].mxu0 }
 0x873   : > { %v2231_v59 = vcombine.high %v2225_v57, %v2225_v57  ;;  %v2238_v32 = vrot.slane %v2225_v57, %v4295_v43  ;;  %v3759_v63 = vpop.f32.mrb[7].mxu0 }
 0x875   : > { %v2245_v18 = vrot.slane %v2231_v59, %v4295_v43  ;;  %v2246_v10 = vcombine.high %v2238_v32, %v2238_v32  ;;  %v2254_v14 = vrot.slane %v2238_v32, %v4295_v43 }
 0x877   : > { %v2247_v17 = vcombine.high %v2245_v18, %v2245_v18  ;;  %v2261_v62 = vrot.slane %v2245_v18, %v4295_v43  ;;  %v2268_v13 = vrot.slane %v2246_v10, %v4295_v43  ;;  %v2276_v30 = vcombine.high %v2254_v14, %v2254_v14 }
 0x878   : > { %v2283_v44 = vrot.slane %v2254_v14, %v4232_v12 }
 0x879   : > { %v2275_v11 = vrot.slane %v2247_v17, %v4295_v43  ;;  %v2277_v27 = vcombine.high %v2261_v62, %v2261_v62  ;;  %v2278_v31 = vcombine.high %v2268_v13, %v2268_v13  ;;  %v2287_v33 = vrot.slane %v2268_v13, %v4232_v12 }
 0x87a   : > { %v2291_v34 = vrot.slane %v2276_v30, %v4232_v12  ;;  %v2299_v36 = vrot.slane %v2261_v62, %v4232_v12  ;;  %v2320_v37 = vadd.f32 %v2283_v44, %v4823_v39 }
 0x87b   : > { %v2279_v22 = vcombine.high %v2275_v11, %v2275_v11  ;;  %v2295_v48 = vrot.slane %v2278_v31, %v4232_v12  ;;  %v2303_v61 = vrot.slane %v2275_v11, %v4232_v12  ;;  %v2307_v43 = vrot.slane %v2277_v27, %v4232_v12 }
 0x87c   : > { %v2328_v28 = vmul.f32 0.2, %v2320_v37  ;;  %v2321_v49 = vadd.f32 %v2287_v33, %v4823_v39  ;;  %v2322_v50 = vadd.f32 %v2291_v34, %v4823_v39  ;;  %v2324_v58 = vadd.f32 %v2299_v36, %v4823_v39 }
 0x87d   : > { %v2323_v54 = vadd.f32 %v2295_v48, %v4823_v39  ;;  %v2325_v51 = vadd.f32 %v2303_v61, %v4823_v39  ;;  %v2326_v47 = vadd.f32 %v2307_v43, %v4823_v39  ;;  %v2311_v7 = vrot.slane %v2279_v22, %v4232_v12 }
 0x87e   : > { %v2336_v35 = vmax.f32 %v2320_v37, %v2328_v28  ;;  %v2329_v6 = vmul.f32 0.2, %v2321_v49  ;;  %v2330_v40 = vmul.f32 0.2, %v2322_v50  ;;  %v2332_v57 = vmul.f32 0.2, %v2324_v58 }
 0x87f   : > { %v2331_v56 = vmul.f32 0.2, %v2323_v54  ;;  %v2327_v21 = vadd.f32 %v2311_v7, %v4823_v39  ;;  %v2333_v63 = vmul.f32 0.2, %v2325_v51  ;;  %v2334_v14 = vmul.f32 0.2, %v2326_v47 }
 0x880   : > { %v2348_v20 = vmul.f32 %v2347_v19, %v2336_v35  ;;  %v2337_v53 = vmax.f32 %v2321_v49, %v2329_v6  ;;  %v2338_v26 = vmax.f32 %v2322_v50, %v2330_v40  ;;  %v2340_v10 = vmax.f32 %v2324_v58, %v2332_v57 }
 0x881   : > { %v2339_v32 = vmax.f32 %v2323_v54, %v2331_v56  ;;  %v2341_v62 = vmax.f32 %v2325_v51, %v2333_v63  ;;  %v2335_v13 = vmul.f32 0.2, %v2327_v21  ;;  %v2342_v44 = vmax.f32 %v2326_v47, %v2334_v14 }
 0x882   : > { %2780 = vrot.lane.b32.xlu0 %v2348_v20, %s5375_s20  ;;  %v2349_v59 = vmul.f32 %v2347_v19, %v2337_v53  ;;  %v2350_v18 = vmul.f32 %v2347_v19, %v2338_v26  ;;  %v2352_v30 = vmul.f32 %v2347_v19, %v2340_v10 }
 0x883   : > { %v2351_v17 = vmul.f32 %v2347_v19, %v2339_v32  ;;  %v2353_v11 = vmul.f32 %v2347_v19, %v2341_v62  ;;  %v2343_v27 = vmax.f32 %v2327_v21, %v2335_v13  ;;  %v2354_v31 = vmul.f32 %v2347_v19, %v2342_v44 }
 0x884   : > { %2782 = vrot.lane.b32.xlu1 %v2349_v59, %s5375_s20  ;;  %v2359_v40 = vsel %vm5379_vm0, %v2349_v59, 0.0  ;;  %v2368_v56 = vsel %vm5385_vm13, %v2352_v30, 0.0  ;;  %vm5390_vm13 = vcmask 1043459  }
 0x885   : > { %v2355_v33 = vmul.f32 %v2347_v19, %v2343_v27 }
 0x886   : > { %2784 = vrot.lane.b32.xlu0 %v2350_v18, %s5375_s20 }
 0x888   : > { %2786 = vrot.lane.b32.xlu1 %v2351_v17, %s5375_s20 }
 0x88a   : > { %2788 = vrot.lane.b32.xlu0 %v2352_v30, %s5375_s20 }
 0x88c   : > { %2790 = vrot.lane.b32.xlu1 %v2353_v11, %s5375_s20 }
 0x88e   : > { %2792 = vrot.lane.b32.xlu0 %v2354_v31, %s5375_s20 }
 0x890   : > { %2794 = vrot.lane.b32.xlu1 %v2355_v33, %s5375_s20 }
 0x8f4   : > { %v2781_v34 = vpop.permute.xlu0 %2780 }
 0x8f5   : > { %v2804_v36 = vsel %vm5374_vm1, %v2781_v34, 0.0  ;;  %vm5380_vm1 = vmmov %vm5379_vm0 }
 0x8f6   : > { %v2783_v37 = vpop.permute.xlu1 %2782  ;;  %2805 = vadd.xlane.f32.xlu0 %v2804_v36 }
 0x8f7   : > { %v2807_v22 = vsel %vm5376_vm3, %v2783_v37, 0.0  ;;  %vm5382_vm3 = vmmov %vm5379_vm0 }
 0x8f8   : > { %v2785_v48 = vpop.permute.xlu0 %2784  ;;  %2808 = vadd.xlane.f32.xlu1 %v2807_v22  ;;  %v2356_v7 = vsel %vm5382_vm3, %v2348_v20, 0.0  ;;  %v2371_v20 = vsel %vm5388_vm14, %v2353_v11, 0.0  ;;  %vm5389_vm3 = vmmov %vm5379_vm0  ;;  %vm5391_vm14 = vcmp.le.f32.partialorder %v4420_v3, 0.49 }
 0x8f9   : > { %v2810_v61 = vsel %vm5377_vm4, %v2785_v48, 0.0  ;;  %vm5383_vm4 = vmmov %vm5379_vm0  ;;  %v2377_v26 = vsel %vm5389_vm3, %v2355_v33, 0.0  ;;  %vm5397_vm3 = vcmask 1047559  }
 0x8fa   : > { %v2787_v43 = vpop.permute.xlu1 %2786  ;;  %2811 = vadd.xlane.f32.xlu0 %v2810_v61 }
 0x8fb   : > { %v2813_v49 = vsel %vm5378_vm5, %v2787_v43, 0.0  ;;  %vm5384_vm5 = vmmov %vm5379_vm0 }
 0x8fc   : > { %v2789_v28 = vpop.permute.xlu0 %2788  ;;  %v2362_v6 = vsel %vm5384_vm5, %v2350_v18, 0.0  ;;  %vm5393_vm5 = vcmask 1044484  }
 0x8fd   : > { %v2816_v19 = vsel %vm5379_vm0, %v2789_v28, 0.0 }
 0x8fe   : > { %2814 = vadd.xlane.f32.xlu0 %v2813_v49  ;;  %v2791_v50 = vpop.permute.xlu1 %2790  ;;  %2817 = vadd.xlane.f32.xlu1 %v2816_v19 }
 0x8ff   : > { %v2819_v54 = vsel %vm5380_vm1, %v2791_v50, 0.0  ;;  %vm5386_vm1 = vmmov %vm5379_vm0 }
 0x900   : > { %v2793_v58 = vpop.permute.xlu0 %2792  ;;  %v2365_v21 = vsel %vm5386_vm1, %v2351_v17, 0.0  ;;  %vm5395_vm1 = vcmp.le.f32.partialorder %v4426_v9, 0.49 }
 0x901   : > { %v2822_v51 = vsel %vm5381_vm2, %v2793_v58, 0.0  ;;  %vm5387_vm2 = vmmov %vm5379_vm0  ;;  %vm5394_vm0 = vcmask 1045509  }
 0x902   : > { %2820 = vadd.xlane.f32.xlu0 %v2819_v54  ;;  %2823 = vadd.xlane.f32.xlu1 %v2822_v51  ;;  %v2795_v47 = vpop.permute.xlu1 %2794  ;;  %v2374_v53 = vsel %vm5387_vm2, %v2354_v31, 0.0  ;;  %vm5396_vm2 = vcmask 1046534  }
 0x903   : > { %v2825_v35 = vsel %vm5383_vm4, %v2795_v47, 0.0  ;;  %vm5392_vm4 = vcmp.le.f32.partialorder %v4422_v29, 0.49 }
 0x906   : > { %2357 = vadd.xlane.f32.xlu1 %v2356_v7  ;;  %2826 = vadd.xlane.f32.xlu0 %v2825_v35 }
 0x90a   : > { %2363 = vadd.xlane.f32.xlu1 %v2362_v6  ;;  %2360 = vadd.xlane.f32.xlu0 %v2359_v40 }
 0x90e   : > { %2369 = vadd.xlane.f32.xlu1 %v2368_v56  ;;  %2366 = vadd.xlane.f32.xlu0 %v2365_v21 }
 0x912   : > { %2375 = vadd.xlane.f32.xlu1 %v2374_v53  ;;  %2372 = vadd.xlane.f32.xlu0 %v2371_v20 }
 0x916   : > { %2378 = vadd.xlane.f32.xlu0 %v2377_v26 }
 0x983   : > { %v2806_v57 = vpop.xlane.xlu0 %2805 }
 0x984   : > { %v4884_v59 = vsel %vm582_vm8, %v2806_v57, -1e+30 }
 0x985   : > { %v2809_v32 = vpop.xlane.xlu1 %2808  ;;  %v2847_v17 = vrot.slane %v4884_v59, %v4436_v16 }
 0x986   : > { %v4888_v63 = vsel %vm583_vm6, %v2809_v32, -1e+30 }
 0x987   : > { %v2851_v18 = vrot.slane %v4888_v63, %v4436_v16  ;;  %v2812_v10 = vpop.xlane.xlu0 %2811 }
 0x988   : > { %v4894_v14 = vsel %vm584_vm7, %v2812_v10, -1e+30 }
 0x989   : > { %v2855_v62 = vrot.slane %v4894_v14, %v4436_v16  ;;  %v2876_v13 = vsel %vm1184_vm10, %v2851_v18, %v2847_v17 }
 0x98b   : > { %v2815_v30 = vpop.xlane.xlu0 %2814  ;;  %v2818_v44 = vpop.xlane.xlu1 %2817  ;;  %v2877_v33 = vsel %vm1186_vm11, %v2855_v62, %v2876_v13 }
 0x98c   : > { %v4903_v11 = vsel %vm585_vm9, %v2815_v30, -1e+30  ;;  %v4907_v27 = vsel %vm586_vm12, %v2818_v44, -1e+30 }
 0x98d   : > { %v2859_v31 = vrot.slane %v4903_v11, %v4436_v16  ;;  %v2863_v34 = vrot.slane %v4907_v27, %v4436_v16 }
 0x98f   : > { %v2878_v36 = vsel %vm5390_vm13, %v2859_v31, %v2877_v33  ;;  %v2821_v37 = vpop.xlane.xlu0 %2820  ;;  %v2824_v22 = vpop.xlane.xlu1 %2823  ;;  %vm5398_vm13 = vcmask 64512  }
 0x990   : > { %v4917_v48 = vsel %vm5391_vm14, %v2821_v37, -1e+30  ;;  %v2834_v61 = vsel %vm5392_vm4, %v2824_v22, -1e+30  ;;  %v2879_v28 = vsel %vm5393_vm5, %v2863_v34, %v2878_v36 }
 0x991   : > { %v2867_v43 = vrot.slane %v4917_v48, %v4436_v16  ;;  %v2871_v49 = vrot.slane %v2834_v61, %v4436_v16 }
 0x993   : > { %v2880_v19 = vsel %vm5394_vm0, %v2867_v43, %v2879_v28  ;;  %v2827_v50 = vpop.xlane.xlu0 %2826  ;;  %v2358_v58 = vpop.xlane.xlu1 %2357 }
 0x994   : > { %v4928_v54 = vsel %vm5395_vm1, %v2827_v50, -1e+30  ;;  %v4934_v47 = vsel %vm582_vm8, %v2358_v58, -1e+30  ;;  %v2881_v7 = vsel %vm5396_vm2, %v2871_v49, %v2880_v19  ;;  %vm5401_vm8 = vmmov %vm5392_vm4 }
 0x995   : > { %v2875_v51 = vrot.slane %v4928_v54, %v4436_v16  ;;  %v2399_v0 = vrot.slane %v4934_v47, %v4436_v16  ;;  %vm5405_vm4 = vmmov %vm5396_vm2 }
 0x997   : > { %v2361_v35 = vpop.xlane.xlu0 %2360  ;;  %v2364_v6 = vpop.xlane.xlu1 %2363  ;;  %v2882_v40 = vsel %vm5397_vm3, %v2875_v51, %v2881_v7 }
 0x998   : > { %v4940_v56 = vsel %vm583_vm6, %v2361_v35, -1e+30  ;;  %v4944_v21 = vsel %vm584_vm7, %v2364_v6, -1e+30  ;;  %v2884_v53 = vsel %vm5398_vm13, %v2882_v40, -inf  ;;  %vm5399_vm6 = vcmask 1043459   ;;  %vm5400_vm7 = vmmov %vm5391_vm14 }
 0x999   : > { %v2403_v20 = vrot.slane %v4940_v56, %v4436_v16  ;;  %2885 = vmax.xlane.f32.xlu1 %v2884_v53  ;;  %v2407_v26 = vrot.slane %v4944_v21, %v4436_v16  ;;  %vm5404_vm14 = vmmov %vm5395_vm1 }
 0x99a   : > { %vm5408_vm1 = vmmov %vm5399_vm6 }
 0x99b   : > { %v2428_v5 = vsel %vm1184_vm10, %v2403_v20, %v2399_v0  ;;  %v2367_v57 = vpop.xlane.xlu0 %2366  ;;  %v2370_v32 = vpop.xlane.xlu1 %2369 }
 0x99c   : > { %v4956_v24 = vsel %vm585_vm9, %v2367_v57, -1e+30  ;;  %v4960_v18 = vsel %vm586_vm12, %v2370_v32, -1e+30  ;;  %v2429_v17 = vsel %vm1186_vm11, %v2407_v26, %v2428_v5  ;;  %vm5402_vm9 = vmmov %vm5393_vm5 }
 0x99d   : > { %v2411_v10 = vrot.slane %v4956_v24, %v4436_v16  ;;  %v2415_v62 = vrot.slane %v4960_v18, %v4436_v16  ;;  %vm5403_vm12 = vmmov %vm5394_vm0 }
 0x99e   : > { %vm5406_vm5 = vmmov %vm5397_vm3 }
 0x99f   : > { %v2430_v13 = vsel %vm5399_vm6, %v2411_v10, %v2429_v17  ;;  %v2373_v30 = vpop.xlane.xlu0 %2372  ;;  %v2376_v44 = vpop.xlane.xlu1 %2375  ;;  %vm5407_vm0 = vmmov %vm5398_vm13 }
 0x9a0   : > { %v4970_v2 = vsel %vm5400_vm7, %v2373_v30, -1e+30  ;;  %v4974_v45 = vsel %vm5401_vm8, %v2376_v44, -1e+30  ;;  %v2431_v33 = vsel %vm5402_vm9, %v2415_v62, %v2430_v13  ;;  %vm5409_vm2 = vmmov %vm5402_vm9 }
 0x9a1   : > { %v2419_v31 = vrot.slane %v4970_v2, %v4436_v16  ;;  %v2423_v34 = vrot.slane %v4974_v45, %v4436_v16  ;;  %vm5410_vm3 = vmmov %vm5403_vm12 }
 0x9a2   : > { %vm5411_vm13 = vmmov %vm5405_vm4 }
 0x9a3   : > { %v2379_v36 = vpop.xlane.xlu0 %2378  ;;  %v2432_v37 = vsel %vm5403_vm12, %v2419_v31, %v2431_v33  ;;  %vm5412_vm6 = vmmov %vm5406_vm5 }
 0x9a4   : > { %v4984_v3 = vsel %vm5404_vm14, %v2379_v36, -1e+30  ;;  %v2433_v22 = vsel %vm5405_vm4, %v2423_v34, %v2432_v37  ;;  %vm5413_vm7 = vmmov %vm5407_vm0 }
 0x9a5   : > { %v2427_v29 = vrot.slane %v4984_v3, %v4436_v16  ;;  %vm5414_vm8 = vmmov %vm5408_vm1 }
 0x9a6   : > { %vm5415_vm9 = vmmov %vm5409_vm2 }
 0x9a7   : > { %v2434_v43 = vsel %vm5406_vm5, %v2427_v29, %v2433_v22  ;;  %vm5416_vm12 = vmmov %vm5410_vm3 }
 0x9a8   : > { %v2436_v28 = vsel %vm5407_vm0, %v2434_v43, -inf  ;;  %vm5417_vm14 = vmmov %vm5405_vm4 }
 0x9a9   : > { %2437 = vmax.xlane.f32.xlu0 %v2436_v28  ;;  %vm5418_vm4 = vmmov %vm5406_vm5 }
 0x9aa   : > { %vm5419_vm5 = vmmov %vm5407_vm0 }
 0x9ab   : > { %vm5420_vm0 = vmmov %vm5408_vm1 }
 0xa26   : > { %v2886_v49 = vpop.xlane.xlu1 %2885 }
 0xa27   : > { %v2891_v19 = vrot.slane %v2886_v49, %v4232_v12  ;;  %v2895_v50 = vrot.slane %v2886_v49, %v4256_v25  ;;  %v2899_v58 = vrot.slane %v2886_v49, %v4547_v42  ;;  %v2907_v9 = vrot.slane %v2886_v49, %v4556_v52 }
 0xa28   : > { %v2903_v51 = vrot.slane %v2886_v49, %v4550_v46  ;;  %v2915_v40 = vrot.slane %v2886_v49, %v4568_v41  ;;  %v2911_v26 = vrot.slane %v2886_v49, %v4563_v60 }
 0xa29   : > { %v2928_v7 = vsub.f32 %v4884_v59, %v2891_v19  ;;  %v2929_v35 = vsub.f32 %v4888_v63, %v2895_v50  ;;  %v2930_v6 = vsub.f32 %v4894_v14, %v2899_v58  ;;  %v2932_v53 = vsub.f32 %v4907_v27, %v2907_v9 }
 0xa2a   : > { %v2931_v5 = vsub.f32 %v4903_v11, %v2903_v51  ;;  %v2934_v32 = vsub.f32 %v2834_v61, %v2915_v40  ;;  %v2919_v59 = vrot.slane %v2886_v49, %v4573_v38  ;;  %v2933_v63 = vsub.f32 %v4917_v48, %v2911_v26 }
 0xa2b   : > { %v2936_v0 = vmul.f32 1.442695, %v2928_v7  ;;  %v2938_v20 = vmul.f32 1.442695, %v2929_v35  ;;  %v2940_v57 = vmul.f32 1.442695, %v2930_v6 }
 0xa2c   : > { %v2944_v10 = vmul.f32 1.442695, %v2932_v53  ;;  %v2942_v14 = vmul.f32 1.442695, %v2931_v5  ;;  %v2948_v17 = vmul.f32 1.442695, %v2934_v32  ;;  %v2935_v27 = vsub.f32 %v4928_v54, %v2919_v59 }
 0xa2d   : > { %3963 = vpow2.f32 %v2936_v0  ;;  %v2946_v62 = vmul.f32 1.442695, %v2933_v63 }
 0xa2e   : > { %3965 = vpow2.f32 %v2938_v20  ;;  %v2950_v48 = vmul.f32 1.442695, %v2935_v27 }
 0xa2f   : > { %3967 = vpow2.f32 %v2940_v57 }
 0xa30   : > { %3969 = vpow2.f32 %v2944_v10 }
 0xa31   : > { %3971 = vpow2.f32 %v2942_v14 }
 0xa32   : > { %3973 = vpow2.f32 %v2948_v17 }
 0xa33   : > { %3975 = vpow2.f32 %v2946_v62 }
 0xa34   : > { %3977 = vpow2.f32 %v2950_v48 }
 0xa36   : > { %v2438_v13 = vpop.xlane.xlu0 %2437 }
 0xa37   : > { %v5006_v11 = vpop.eup %3963  ;;  %v2443_v61 = vrot.slane %v2438_v13, %v4232_v12  ;;  %v2447_v30 = vrot.slane %v2438_v13, %v4256_v25  ;;  %v2451_v44 = vrot.slane %v2438_v13, %v4547_v42  ;;  %v2455_v33 = vrot.slane %v2438_v13, %v4550_v46 }
 0xa38   : > { %v5011_v31 = vpop.eup %3965  ;;  %2961 = vperm.xlu1 %3924, %v5006_v11   ;;  %v2459_v54 = vrot.slane %v2438_v13, %v4556_v52  ;;  %v2463_v28 = vrot.slane %v2438_v13, %v4563_v60 }
 0xa39   : > { %v2480_v34 = vsub.f32 %v4934_v47, %v2443_v61  ;;  %v2481_v36 = vsub.f32 %v4940_v56, %v2447_v30  ;;  %v2482_v37 = vsub.f32 %v4944_v21, %v2451_v44  ;;  %2964 = vperm.xlu0 %3925, %v5011_v31   ;;  %v5020_v29 = vpop.eup %3967  ;;  %v2483_v49 = vsub.f32 %v4956_v24, %v2455_v33 }
 0xa3a   : > { %v5022_v43 = vpop.eup %3969  ;;  %v2467_v47 = vrot.slane %v2438_v13, %v4568_v41  ;;  %v2484_v56 = vsub.f32 %v4960_v18, %v2459_v54  ;;  %v2485_v9 = vsub.f32 %v4970_v2, %v2463_v28  ;;  %v2471_v24 = vrot.slane %v2438_v13, %v4573_v38 }
 0xa3b   : > { %v2488_v22 = vmul.f32 1.442695, %v2480_v34  ;;  %v2490_v19 = vmul.f32 1.442695, %v2481_v36  ;;  %v2492_v21 = vmul.f32 1.442695, %v2482_v37  ;;  %v5030_v50 = vpop.eup %3971 }
 0xa3c   : > { %2967 = vperm.xlu1 %3924, %v5020_v29   ;;  %v5032_v58 = vpop.eup %3973  ;;  %v2494_v51 = vmul.f32 1.442695, %v2483_v49  ;;  %v2486_v7 = vsub.f32 %v4974_v45, %v2467_v47  ;;  %v2496_v18 = vmul.f32 1.442695, %v2484_v56  ;;  %v2498_v6 = vmul.f32 1.442695, %v2485_v9 }
 0xa3d   : > { %3979 = vpow2.f32 %v2488_v22  ;;  %2973 = vperm.xlu0 %3925, %v5022_v43   ;;  %v5039_v35 = vpop.eup %3975  ;;  %v2487_v2 = vsub.f32 %v4984_v3, %v2471_v24 }
 0xa3e   : > { %3981 = vpow2.f32 %v2490_v19  ;;  %v2500_v40 = vmul.f32 1.442695, %v2486_v7  ;;  %v5043_v53 = vpop.eup %3977 }
 0xa3f   : > { %3983 = vpow2.f32 %v2492_v21  ;;  %v2502_v45 = vmul.f32 1.442695, %v2487_v2 }
 0xa40   : > { %2970 = vperm.xlu1 %3924, %v5030_v50   ;;  %3985 = vpow2.f32 %v2494_v51 }
 0xa41   : > { %2979 = vperm.xlu0 %3925, %v5032_v58   ;;  %3987 = vpow2.f32 %v2496_v18 }
 0xa42   : > { %3989 = vpow2.f32 %v2498_v6 }
 0xa43   : > { %3991 = vpow2.f32 %v2500_v40 }
 0xa44   : > { %2976 = vperm.xlu1 %3924, %v5039_v35   ;;  %3993 = vpow2.f32 %v2502_v45 }
 0xa47   : > { %v5045_v0 = vpop.eup %3979 }
 0xa48   : > { %2982 = vperm.xlu1 %3924, %v5043_v53   ;;  %2513 = vperm.xlu0 %3925, %v5045_v0   ;;  %v5049_v20 = vpop.eup %3981 }
 0xa49   : > { %v5051_v26 = vpop.eup %3983 }
 0xa4a   : > { %v5055_v3 = vpop.eup %3985 }
 0xa4b   : > { %v5057_v5 = vpop.eup %3987 }
 0xa4c   : > { %2516 = vperm.xlu1 %3924, %v5049_v20   ;;  %2519 = vperm.xlu0 %3925, %v5051_v26   ;;  %v5061_v57 = vpop.eup %3989 }
 0xa4d   : > { %v5063_v32 = vpop.eup %3991 }
 0xa4e   : > { %v5067_v10 = vpop.eup %3993 }
 0xa50   : > { %2522 = vperm.xlu1 %3924, %v5055_v3   ;;  %2525 = vperm.xlu0 %3925, %v5057_v5  }
 0xa54   : > { %2528 = vperm.xlu1 %3924, %v5061_v57   ;;  %2531 = vperm.xlu0 %3925, %v5063_v32  }
 0xa58   : > { %2534 = vperm.xlu1 %3924, %v5067_v10  }
 0xab7   : > { %v2962_v59 = vpop.permute.xlu1 %2961 }
 0xab8   : > { %v2965_v63 = vpop.permute.xlu0 %2964  ;;  %v2987_v17 = vrot.slane %v2962_v59, %v4436_v16 }
 0xab9   : > { %v2991_v27 = vrot.slane %v2965_v63, %v4436_v16 }
 0xabb   : > { %v2968_v14 = vpop.permute.xlu1 %2967  ;;  %v3016_v30 = vsel %vm1184_vm10, %v2991_v27, %v2987_v17 }
 0xabc   : > { %v2995_v62 = vrot.slane %v2968_v14, %v4436_v16  ;;  %v2974_v13 = vpop.permute.xlu0 %2973 }
 0xabd   : > { %v3003_v54 = vrot.slane %v2974_v13, %v4436_v16 }
 0xabe   : > { %v3017_v48 = vsel %vm1186_vm11, %v2995_v62, %v3016_v30 }
 0xabf   : > { %v2971_v61 = vpop.permute.xlu1 %2970 }
 0xac0   : > { %v2999_v44 = vrot.slane %v2971_v61, %v4436_v16  ;;  %v2980_v34 = vpop.permute.xlu0 %2979 }
 0xac1   : > { %v3011_v49 = vrot.slane %v2980_v34, %v4436_v16 }
 0xac2   : > { %v3018_v33 = vsel %vm5408_vm1, %v2999_v44, %v3017_v48  ;;  %vm5421_vm1 = vmmov %vm5409_vm2 }
 0xac3   : > { %v2977_v36 = vpop.permute.xlu1 %2976  ;;  %v3019_v22 = vsel %vm5409_vm2, %v3003_v54, %v3018_v33  ;;  %vm5422_vm2 = vmmov %vm5410_vm3 }
 0xac4   : > { %v3007_v37 = vrot.slane %v2977_v36, %v4436_v16 }
 0xac6   : > { %v3020_v28 = vsel %vm5410_vm3, %v3007_v37, %v3019_v22  ;;  %vm5423_vm3 = vmmov %vm5411_vm13 }
 0xac7   : > { %v2983_v19 = vpop.permute.xlu1 %2982  ;;  %v2514_v47 = vpop.permute.xlu0 %2513  ;;  %v3021_v21 = vsel %vm5411_vm13, %v3011_v49, %v3020_v28  ;;  %vm5424_vm13 = vmmov %vm5418_vm4 }
 0xac8   : > { %v3015_v56 = vrot.slane %v2983_v19, %v4436_v16  ;;  %v2539_v18 = vrot.slane %v2514_v47, %v4436_v16 }
 0xaca   : > { %v3022_v9 = vsel %vm5412_vm6, %v3015_v56, %v3021_v21  ;;  %vm5425_vm6 = vmmov %vm5419_vm5 }
 0xacb   : > { %v2517_v51 = vpop.permute.xlu1 %2516  ;;  %v2520_v24 = vpop.permute.xlu0 %2519  ;;  %v3024_v7 = vsel %vm5413_vm7, %v3022_v9, 0.0  ;;  %vm5426_vm7 = vmmov %vm5420_vm0 }
 0xacc   : > { %v2543_v6 = vrot.slane %v2517_v51, %v4436_v16  ;;  %3025 = vadd.xlane.f32.xlu0 %v3024_v7  ;;  %v2547_v2 = vrot.slane %v2520_v24, %v4436_v16 }
 0xace   : > { %v2568_v40 = vsel %vm1184_vm10, %v2543_v6, %v2539_v18 }
 0xacf   : > { %v2523_v45 = vpop.permute.xlu1 %2522  ;;  %v2526_v59 = vpop.permute.xlu0 %2525  ;;  %v2569_v14 = vsel %vm1186_vm11, %v2547_v2, %v2568_v40 }
 0xad0   : > { %v2551_v63 = vrot.slane %v2523_v45, %v4436_v16  ;;  %v2555_v17 = vrot.slane %v2526_v59, %v4436_v16 }
 0xad2   : > { %v2570_v27 = vsel %vm5414_vm8, %v2551_v63, %v2569_v14  ;;  %vm5427_vm8 = vmmov %vm5421_vm1 }
 0xad3   : > { %v2529_v62 = vpop.permute.xlu1 %2528  ;;  %v2532_v13 = vpop.permute.xlu0 %2531  ;;  %v2571_v30 = vsel %vm5415_vm9, %v2555_v17, %v2570_v27  ;;  %vm5428_vm9 = vmmov %vm5422_vm2 }
 0xad4   : > { %v2559_v61 = vrot.slane %v2529_v62, %v4436_v16  ;;  %v2563_v44 = vrot.slane %v2532_v13, %v4436_v16 }
 0xad6   : > { %v2572_v48 = vsel %vm5416_vm12, %v2559_v61, %v2571_v30  ;;  %vm5430_vm12 = vmmov %vm5418_vm4 }
 0xad7   : > { %v2535_v33 = vpop.permute.xlu1 %2534  ;;  %v2573_v34 = vsel %vm5417_vm14, %v2563_v44, %v2572_v48  ;;  %vm5432_vm14 = vcmask 261120  }
 0xad8   : > { %v2567_v54 = vrot.slane %v2535_v33, %v4436_v16 }
 0xada   : > { %v2574_v36 = vsel %vm5418_vm4, %v2567_v54, %v2573_v34  ;;  %vm5433_vm4 = vmmov %vm5419_vm5 }
 0xadb   : > { %v2576_v37 = vsel %vm5419_vm5, %v2574_v36, 0.0 }
 0xadc   : > { %2577 = vadd.xlane.f32.xlu1 %v2576_v37 }
 0xb59   : > { %v3026_v22 = vpop.xlane.xlu0 %3025 }
 0xb5a   : > { %3995 = vrcp.f32 %v3026_v22 }
 0xb64   : > { %v3996_v28 = vpop.eup %3995 }
 0xb65   : > { %v3036_v49 = vrot.slane %v3996_v28, %v4256_v25  ;;  %v3032_v19 = vrot.slane %v3996_v28, %v4232_v12  ;;  %v3044_v21 = vrot.slane %v3996_v28, %v4550_v46  ;;  %v3040_v9 = vrot.slane %v3996_v28, %v4547_v42 }
 0xb66   : > { %v3052_v18 = vrot.slane %v3996_v28, %v4563_v60  ;;  %v3048_v6 = vrot.slane %v3996_v28, %v4556_v52  ;;  %v3060_v2 = vrot.slane %v3996_v28, %v4573_v38  ;;  %v3056_v40 = vrot.slane %v3996_v28, %v4568_v41 }
 0xb67   : > { %v3070_v47 = vmul.f32 %v5011_v31, %v3036_v49  ;;  %v3069_v56 = vmul.f32 %v5006_v11, %v3032_v19  ;;  %v3072_v24 = vmul.f32 %v5030_v50, %v3044_v21  ;;  %v3071_v7 = vmul.f32 %v5020_v29, %v3040_v9 }
 0xb68   : > { %v3074_v11 = vmul.f32 %v5039_v35, %v3052_v18  ;;  %v3073_v31 = vmul.f32 %v5022_v43, %v3048_v6  ;;  %v3076_v50 = vmul.f32 %v5043_v53, %v3060_v2  ;;  %v3075_v29 = vmul.f32 %v5032_v58, %v3056_v40 }
 0xb69   : > { %v2578_v51 = vpop.xlane.xlu1 %2577  ;;  %3089 = vperm.xlu1 %3924, %v3070_v47   ;;  %3086 = vperm.xlu0 %3925, %v3069_v56  }
 0xb6a   : > { %3997 = vrcp.f32 %v2578_v51 }
 0xb6d   : > { %3095 = vperm.xlu1 %3924, %v3072_v24   ;;  %3092 = vperm.xlu0 %3925, %v3071_v7  }
 0xb71   : > { %3101 = vperm.xlu1 %3924, %v3074_v11   ;;  %3098 = vperm.xlu0 %3925, %v3073_v31  }
 0xb74   : > { %v3998_v45 = vpop.eup %3997 }
 0xb75   : > { %3107 = vperm.xlu1 %3924, %v3076_v50   ;;  %3104 = vperm.xlu0 %3925, %v3075_v29   ;;  %v2584_v59 = vrot.slane %v3998_v45, %v4232_v12  ;;  %v2592_v35 = vrot.slane %v3998_v45, %v4547_v42  ;;  %v2588_v43 = vrot.slane %v3998_v45, %v4256_v25 }
 0xb76   : > { %v2600_v58 = vrot.slane %v3998_v45, %v4556_v52  ;;  %v2596_v17 = vrot.slane %v3998_v45, %v4550_v46  ;;  %v2604_v27 = vrot.slane %v3998_v45, %v4563_v60  ;;  %v2612_v52 = vrot.slane %v3998_v45, %v4573_v38 }
 0xb77   : > { %v2621_v63 = vmul.f32 %v5045_v0, %v2584_v59  ;;  %v2623_v14 = vmul.f32 %v5051_v26, %v2592_v35  ;;  %v2622_v53 = vmul.f32 %v5049_v20, %v2588_v43  ;;  %v2608_v0 = vrot.slane %v3998_v45, %v4568_v41 }
 0xb78   : > { %v2625_v12 = vmul.f32 %v5057_v5, %v2600_v58  ;;  %v2624_v42 = vmul.f32 %v5055_v3, %v2596_v17  ;;  %v2626_v20 = vmul.f32 %v5061_v57, %v2604_v27  ;;  %v2628_v46 = vmul.f32 %v5067_v10, %v2612_v52  ;;  %v3316_v52 = vld [vmem:[%s5345_s9] sm:$0xff] }
 0xb79   : > { %2638 = vperm.xlu1 %3924, %v2621_v63   ;;  %3149 = vrot.lane.b32.xlu0 %v4823_v39, %s5375_s20  ;;  %v2627_v39 = vmul.f32 %v5063_v32, %v2608_v0  ;;  %v3232_v0 = vrot.slane %v4837_v15, %v4256_v25  ;;  %v3317_v25 = vld [vmem:[%s5345_s9 + $0x8] sm:$0xff]  ;;  %v3318_v15 = vld [vmem:[%s5345_s9 + $0x10] sm:$0xff] }
 0xb7d   : > { %2644 = vperm.xlu1 %3924, %v2623_v14   ;;  %2641 = vperm.xlu0 %3925, %v2622_v53  }
 0xb81   : > { %2650 = vperm.xlu1 %3924, %v2625_v12   ;;  %2647 = vperm.xlu0 %3925, %v2624_v42  }
 0xb85   : > { %2656 = vperm.xlu1 %3924, %v2627_v39   ;;  %2653 = vperm.xlu0 %3925, %v2626_v20  }
 0xb89   : > { %2659 = vperm.xlu0 %3925, %v2628_v46   ;;  %v3837_v46 = vpack.c.bf16 %v3317_v25, %v3316_v52 }
 0xb8d   : > { %3306 = vrot.lane.b32.xlu0 %v4825_v23, %s4071_s0 }
 0xbe8   : > { %v3090_v26 = vpop.permute.xlu1 %3089  ;;  %v3087_v41 = vpop.permute.xlu0 %3086 }
 0xbe9   : > { %v3116_v60 = vrot.slane %v3090_v26, %v4436_v16  ;;  %v3112_v3 = vrot.slane %v3087_v41, %v4436_v16  ;;  %v3321_v41 = vld [vmem:[%s5345_s9 + $0x28] sm:$0xff] }
 0xbeb   : > { %v3141_v38 = vsel %vm1184_vm10, %v3116_v60, %v3112_v3  ;;  %v3322_v3 = vld [vmem:[%s5345_s9 + $0x30] sm:$0xff] }
 0xbec   : > { %v3096_v5 = vpop.permute.xlu1 %3095  ;;  %v3093_v32 = vpop.permute.xlu0 %3092 }
 0xbed   : > { %v3120_v57 = vrot.slane %v3093_v32, %v4436_v16  ;;  %v3124_v62 = vrot.slane %v3096_v5, %v4436_v16  ;;  %v3323_v5 = vld [vmem:[%s5345_s9 + $0x38] sm:$0xff] }
 0xbee   : > { %v3846_v32 = vpack.c.bf16 %v3323_v5, %v3322_v3 }
 0xbef   : > { %v3142_v10 = vsel %vm1186_vm11, %v3120_v57, %v3141_v38  ;;  %v3324_v57 = vld [vmem:[%s5345_s9 + $0x40] sm:$0xff]  ;;  %v3325_v38 = vld [vmem:[%s5345_s9 + $0x48] sm:$0xff] }
 0xbf0   : > { %v3102_v13 = vpop.permute.xlu1 %3101  ;;  %v3099_v61 = vpop.permute.xlu0 %3098  ;;  %v3143_v44 = vsel %vm5420_vm0, %v3124_v62, %v3142_v10  ;;  %v3849_v62 = vpack.c.bf16 %v3325_v38, %v3324_v57  ;;  %v3326_v10 = vld [vmem:[%s5345_s9 + $0x50] sm:$0xff] }
 0xbf1   : > { %v3128_v23 = vrot.slane %v3099_v61, %v4436_v16  ;;  %v3132_v30 = vrot.slane %v3102_v13, %v4436_v16  ;;  %v3327_v13 = vld [vmem:[%s5345_s9 + $0x58] sm:$0xff] }
 0xbf2   : > { %v3852_v61 = vpack.c.bf16 %v3327_v13, %v3326_v10 }
 0xbf3   : > { %v3144_v48 = vsel %vm5421_vm1, %v3128_v23, %v3143_v44  ;;  %v3328_v23 = vld [vmem:[%s5345_s9 + $0x60] sm:$0xff]  ;;  %vm5436_vm1 = vcmask 523264  }
 0xbf4   : > { %v3108_v33 = vpop.permute.xlu1 %3107  ;;  %v3105_v54 = vpop.permute.xlu0 %3104  ;;  %v3145_v37 = vsel %vm5422_vm2, %v3132_v30, %v3144_v48  ;;  %v3329_v30 = vld [vmem:[%s5345_s9 + $0x68] sm:$0xff]  ;;  %v3330_v48 = vld [vmem:[%s5345_s9 + $0x70] sm:$0xff] }
 0xbf5   : > { %v3140_v34 = vrot.slane %v3108_v33, %v4436_v16  ;;  %v3136_v36 = vrot.slane %v3105_v54, %v4436_v16  ;;  %v3855_v44 = vpack.c.bf16 %v3329_v30, %v3328_v23  ;;  %v3331_v33 = vld [vmem:[%s5345_s9 + $0x78] sm:$0xff] }
 0xbf6   : > { %v3858_v54 = vpack.c.bf16 %v3331_v33, %v3330_v48 }
 0xbf7   : > { %v3146_v22 = vsel %vm5423_vm3, %v3136_v36, %v3145_v37  ;;  %v3333_v36 = vld [vmem:[%s5345_s9 + $0x88] sm:$0xff] }
 0xbf8   : > { %v2639_v28 = vpop.permute.xlu1 %2638  ;;  %v3150_v49 = vpop.permute.xlu0 %3149  ;;  %v3147_v19 = vsel %vm5424_vm13, %v3140_v34, %v3146_v22  ;;  %v3332_v34 = vld [vmem:[%s5345_s9 + $0x80] sm:$0xff]  ;;  %v3334_v22 = vld [vmem:[%s5345_s9 + $0x90] sm:$0xff] }
 0xbf9   : > { %3766 = vmatpush3.msra.mxu0 %v3150_v49  ;;  %v2664_v21 = vrot.slane %v2639_v28, %v4436_v16  ;;  %v3861_v37 = vpack.c.bf16 %v3333_v36, %v3332_v34  ;;  %v3335_v28 = vld [vmem:[%s5345_s9 + $0x98] sm:$0xff] }
 0xbfa   : > { %3768 = vmatmul.mubr.msk.f32.vlgmr.msra.gmra.mrb[8].mxu0 %vm5425_vm6, %v3147_v19  ;;  %3836 = vmatprep.subr.bf16.mxu0 %v4067_v4  ;;  %v3864_v49 = vpack.c.bf16 %v3335_v28, %v3334_v22  ;;  %v3410_v19 = vld [vmem:[%s5347_s11] sm:$0xff] }
 0xbfb   : > { %3838 = vmatpush1.bf16.msra.mxu0 %v3837_v46 }
 0xbfc   : > { %v2645_v47 = vpop.permute.xlu1 %2644  ;;  %v2642_v56 = vpop.permute.xlu0 %2641  ;;  %3839 = vmatprep.subr.bf16.mxu0 %v4067_v4 }
 0xbfd   : > { %v2668_v9 = vrot.slane %v2642_v56, %v4436_v16  ;;  %v2672_v51 = vrot.slane %v2645_v47, %v4436_v16  ;;  %v3411_v47 = vld [vmem:[%s5347_s11 + $0x8] sm:$0xff]  ;;  %v3412_v56 = vld [vmem:[%s5347_s11 + $0x10] sm:$0xff] }
 0xbff   : > { %v2693_v24 = vsel %vm1184_vm10, %v2668_v9, %v2664_v21  ;;  %vm5429_vm10 = vmmov %vm5423_vm3  ;;  %v3867_v21 = vpack.c.bf16 %v3411_v47, %v3410_v19  ;;  %v3413_v9 = vld [vmem:[%s5347_s11 + $0x18] sm:$0xff] }
 0xc00   : > { %v2651_v7 = vpop.permute.xlu1 %2650  ;;  %v2648_v18 = vpop.permute.xlu0 %2647  ;;  %v2694_v31 = vsel %vm1186_vm11, %v2672_v51, %v2693_v24  ;;  %vm5431_vm11 = vmmov %vm5419_vm5  ;;  %v3870_v51 = vpack.c.bf16 %v3413_v9, %v3412_v56  ;;  %v3414_v24 = vld [vmem:[%s5347_s11 + $0x20] sm:$0xff] }
 0xc01   : > { %v2676_v6 = vrot.slane %v2648_v18, %v4436_v16  ;;  %v2680_v11 = vrot.slane %v2651_v7, %v4436_v16  ;;  %v3415_v7 = vld [vmem:[%s5347_s11 + $0x28] sm:$0xff]  ;;  %vm5434_vm5 = vmmov %vm5432_vm14 }
 0xc02   : > { %v3873_v18 = vpack.c.bf16 %v3415_v7, %v3414_v24  ;;  %vm5435_vm0 = vmmov %vm5434_vm5 }
 0xc03   : > { %v2695_v2 = vsel %vm5426_vm7, %v2676_v6, %v2694_v31 }
 0xc04   : > { %v2657_v40 = vpop.permute.xlu1 %2656  ;;  %v2654_v50 = vpop.permute.xlu0 %2653  ;;  %v2696_v59 = vsel %vm5427_vm8, %v2680_v11, %v2695_v2 }
 0xc05   : > { %v2684_v29 = vrot.slane %v2654_v50, %v4436_v16  ;;  %v2688_v45 = vrot.slane %v2657_v40, %v4436_v16 }
 0xc07   : > { %v2697_v63 = vsel %vm5428_vm9, %v2684_v29, %v2696_v59  ;;  %v3416_v29 = vld [vmem:[%s5347_s11 + $0x30] sm:$0xff] }
 0xc08   : > { %v2660_v35 = vpop.permute.xlu0 %2659  ;;  %v2698_v14 = vsel %vm5429_vm10, %v2688_v45, %v2697_v63 }
 0xc09   : > { %v2692_v43 = vrot.slane %v2660_v35, %v4436_v16 }
 0xc0b   : > { %v2699_v53 = vsel %vm5430_vm12, %v2692_v43, %v2698_v14  ;;  %v3418_v14 = vld [vmem:[%s5348_s12] sm:$0x1] }
 0xc0c   : > { %3763 = vmatmul.mubr.msk.f32.vlgmr.msra.gmra.mrb[12].mxu1 %vm5431_vm11, %v2699_v53  ;;  %v3307_v31 = vpop.permute.xlu0 %3306 }
 0xc0d   : > { %3772 = vmatprep.mubr.msk.f32.mxu1 %vm5373_vm15, %v4065_v1  ;;  %v3313_v2 = vsel %vm5434_vm5, %v4745_v55, %v3307_v31  ;;  %v3336_v55 = vld [vmem:[%s5346_s10] sm:$0x1] }
 0xccd   : > { %v3220_v58 = vpop.f32.mrb[8].mxu0 }
 0xcce   : > { %3225 = vrot.lane.b32.xlu1 %v3220_v58, %s4071_s0  ;;  %v3769_v17 = vpop.f32.mrb[9].mxu0 }
 0xcdf   : > { %v2768_v12 = vpop.f32.mrb[12].mxu1 }
 0xce0   : > { %v3764_v42 = vpop.f32.mrb[13].mxu1 }
 0xd40   : > { %v3226_v27 = vpop.permute.xlu1 %3225 }
 0xd41   : > { %v3228_v16 = vsel %vm5432_vm14, %v2768_v12, %v3226_v27 }
 0xd42   : > { %v3233_v39 = vadd.f32 %v3232_v0, %v3228_v16 }
 0xd44   : > { %v3234_v20 = vmax.f32 %v3233_v39, 0.0 }
 0xd46   : > { %3771 = vmatpush3.msra.mxu1 %v3234_v20 }
 0xd47   : > { %3773 = vmatmul.mubr.msk.f32.vlgmr.msra.gmra.mrb[14].mxu1 %vm5433_vm4, %v4795_v8  ;;  %3866 = vmatprep.subr.bf16.mxu1 %v4067_v4  ;;  %v3319_v8 = vld [vmem:[%s5345_s9 + $0x18] sm:$0xff] }
 0xd48   : > { %3791 = vmatprep.mubr.msk.f32.mxu1 %vm5373_vm15, %v4065_v1  ;;  %v3840_v26 = vpack.c.bf16 %v3319_v8, %v3318_v15  ;;  %v3320_v1 = vld [vmem:[%s5345_s9 + $0x20] sm:$0xff]  ;;  %3868 = vmatpush3.bf16.msra.mxu1 %v3867_v21  ;;  %vm3314_vm15 = vcmask 785408  }
 0xd49   : > { %v3843_v60 = vpack.c.bf16 %v3321_v41, %v3320_v1  ;;  %3869 = vmatprep.subr.bf16.mxu1 %v4067_v4 }
 0xd4a   : > { %3841 = vmatpush1.bf16.msra.mxu0 %v3840_v26 }
 0xd4b   : > { %3842 = vmatprep.subr.bf16.mxu0 %v4067_v4 }
 0xd4c   : > { %3871 = vmatpush3.bf16.msra.mxu1 %v3870_v51 }
 0xd4d   : > { %3872 = vmatprep.subr.bf16.mxu1 %v4067_v4 }
 0xd4e   : > { %3844 = vmatpush1.bf16.msra.mxu0 %v3843_v60 }
 0xd4f   : > { %3845 = vmatprep.subr.bf16.mxu0 %v4067_v4 }
 0xd50   : > { %3874 = vmatpush3.bf16.msra.mxu1 %v3873_v18 }
 0xd51   : > { %3875 = vmatprep.subr.bf16.mxu1 %v4067_v4 }
 0xd52   : > { %3847 = vmatpush1.bf16.msra.mxu0 %v3846_v32 }
 0xd53   : > { %3848 = vmatprep.subr.bf16.mxu0 %v4067_v4 }
 0xd56   : > { %3850 = vmatpush1.bf16.msra.mxu0 %v3849_v62 }
 0xd57   : > { %3851 = vmatprep.subr.bf16.mxu0 %v4067_v4 }
 0xd5a   : > { %3853 = vmatpush1.bf16.msra.mxu0 %v3852_v61 }
 0xd5b   : > { %3854 = vmatprep.subr.bf16.mxu0 %v4067_v4 }
 0xd5e   : > { %3856 = vmatpush1.bf16.msra.mxu0 %v3855_v44 }
 0xd5f   : > { %3857 = vmatprep.subr.bf16.mxu0 %v4067_v4 }
 0xd62   : > { %3859 = vmatpush1.bf16.msra.mxu0 %v3858_v54 }
 0xd63   : > { %3860 = vmatprep.subr.bf16.mxu0 %v4067_v4 }
 0xd66   : > { %3862 = vmatpush1.bf16.msra.mxu0 %v3861_v37 }
 0xd67   : > { %3863 = vmatprep.subr.bf16.mxu0 %v4067_v4  ;;  %v3417_v4 = vld [vmem:[%s5347_s11 + $0x38] sm:$0xff] }
 0xd68   : > { %v3876_v45 = vpack.c.bf16 %v3417_v4, %v3416_v29 }
 0xd6a   : > { %3865 = vmatpush1.bf16.msra.mxu0 %v3864_v49  ;;  %3877 = vmatpush3.bf16.msra.mxu1 %v3876_v45 }
 0xe1a   : > { %v3301_v6 = vpop.f32.mrb[14].mxu1 }
 0xe1b   : > { %3310 = vrot.lane.b32.xlu1 %v3301_v6, %s5375_s20  ;;  %v3774_v11 = vpop.f32.mrb[15].mxu1 }
 0xe8d   : > { %v3311_v40 = vpop.permute.xlu1 %3310 }
 0xe8e   : > { %v3315_v50 = vsel %vm3314_vm15, %v3313_v2, %v3311_v40  ;;  %3601 = vmatprep.mubr.msk.f32.mxu0 %vm5435_vm0, %v3311_v40 }
 0xe8f   : > { %3404 = vmatmul.mubr.f32.vlgmr.msra.gmra.mrb[10].mxu0 %v3315_v50 }
 0xf62   : > { %v3405_v59 = vpop.f32.mrb[10].mxu0 }
 0xf63   : > { %v3406_v63 = vadd.f32 %v3405_v59, %v3336_v55  ;;  %v3407_v35 = vpop.f32.mrb[11].mxu0 }
 0xf65   : > { %v3409_v43 = vmax.f32 %v3406_v63, 0.0 }
 0xf67   : > { %3792 = vmatmul.mubr.msk.f32.vlgmr.msra.gmra.mrb[16].mxu1 %vm5436_vm1, %v3409_v43 }
0x103a   : > { %v3488_v53 = vpop.f32.mrb[16].mxu1 }
0x103b   : > { %v3489_v58 = vadd.f32 %v3488_v53, %v3418_v14  ;;  %v3793_v17 = vpop.f32.mrb[17].mxu1 }
0x103d   : > { %3492 = vst [vmem:[%s441_s30] sm:$0x1] %v3489_v58 }
0x103e   : > { %4014 = shalt.err (!%p4011_p3)
}
0x103f   : > { %s4015_s22 = scalar_lea.hbm %s5294_s24, 16  ;;  %s4019_s20 = scalar_lea.hbm %s5349_s13, 32 }
0x1040   : > { %p4016_p4 = scmp.ne.s32.totalorder %s5294_s24, %s4015_s22  ;;  %p4020_p9 = scmp.lt.u32.totalorder %s5294_s24, %s5349_s13 }
0x1041   : > { %p4021_p10 = scmp.lt.u32.totalorder %s4019_s20, %s4015_s22  ;;  %p4023_p12 = scmp.lt.u32.totalorder %s4015_s22, %s5294_s24 }
0x1042   : > { %p4017_p7 = pnand %p4016_p4, %p4181_p5 }
0x1043   : > { %p4022_p11 = por %p4021_p10, %p4020_p9 }
0x1044   : > { %p4018_p8 = pneg %p4017_p7 }
0x1045   : > { %p4024_p13 = por %p4023_p12, %p4022_p11 }
0x1047   : > { %p4025_p0 = pnand %p4024_p13, %p4018_p8 }
0x1049   : > { %4028 = shalt.err (!%p4025_p0)
}
0x104a   : > { %3878 = dma.vmem_to_hbm [thread:$0]  (%p4181_p5), %s5296_s16, 16, %s5294_s24, %s3494_s21  }
0x104b PF: > { %p3884_p1 = scmp.ge.s32.totalorder %s4063_s28, 2  ;;  %s3518_s1 = sand.u32 1, %s4051_s25  }
0x104c   : > { %s3519_s2 = scalar_lea.sflag [#allocation3], %s3518_s1 }
0x104d   : > { %p3881_p2 = pnand %p3884_p1, %p4185_p6 }
0x104f   : > { %4046 = dma.done.wait (!%p3881_p2), %s3519_s2, 16  }
0x1050   : > { %4048 = vsyncadd (!%p3881_p2), %s3519_s2, 4294967280  ;;  %p23_p3 = scmp.ge.s32.totalorder %s4168_s14, 4   ;;  %s5437_s25 = smov %s4055_s26 }
0x1051   : > { %s5438_s26 = smov %s4059_s27  ;;  %s5439_s27 = smov %s4179_s17 }
0x1052   : > { %s5440_s28 = smov %s4168_s14  ;;  %25 = sbr.rel (!%p23_p3) target bundleno = 7 (0x7), region = 112 }
0x1059   :  { %3523 = vsyncpa [#allocation3], 1 }
0x105a   :  { %3525 = vsyncpa [#allocation3 + $0x1], 1 }

</bundles_post_ra>
